<compile_context>
chip_gen: v5e
topology: v5e:2x2
jax: 0.10.0
libtpu: 0.0.40
codegen_flags: <defaults>
</compile_context>

<pallas_src>
import math
import jax
import jax.numpy as jnp
from jax.experimental import pallas as pl
from jax.experimental.pallas import tpu as pltpu


def _leaky_relu(x, slope=0.01):
    return jnp.where(x >= 0, x, slope * x)


def _round_up(x, m):
    return ((x + m - 1) // m) * m


# ---------------------------------------------------------------------------
# Kernel
# ---------------------------------------------------------------------------
def efnet_kernel(img_ref, txt_ref,
                 wv_ref, bv_ref,
                 wt_ref, bt_ref,
                 wa_ref, ba_ref,
                 w1_ref, b1_ref,
                 w2_ref, b2_ref,
                 wc_ref, bc_ref,
                 out_ref):
    f32 = jnp.float32
    bf16 = jnp.bfloat16
    eps = 1e-12  # F.normalize clamp_min eps

    def l2_normalize(x):
        # x / max(||x||, eps)  ==  x * rsqrt(max(sum(x^2), eps^2))   (EUP rsqrt, no divide)
        sumsq = jnp.sum(x * x, axis=1, keepdims=True)
        return x * jax.lax.rsqrt(jnp.maximum(sumsq, eps * eps))

    # --- vision branch: normalize -> Linear(512,256) -> leaky_relu ---
    x1 = l2_normalize(img_ref[...].astype(f32))
    xv = jnp.dot(x1.astype(bf16), wv_ref[...], preferred_element_type=f32) + bv_ref[...]
    xv = _leaky_relu(xv)

    # --- text branch: normalize -> Linear(768,256) -> leaky_relu ---
    x2 = l2_normalize(txt_ref[...].astype(f32))
    xt = jnp.dot(x2.astype(bf16), wt_ref[...], preferred_element_type=f32) + bt_ref[...]
    xt = _leaky_relu(xt)

    # --- early fusion ---
    xvt = xv * xt

    # attention: Linear(256,256) -> softmax over features (dim=1)
    a = jnp.dot(xvt.astype(bf16), wa_ref[...], preferred_element_type=f32) + ba_ref[...]
    a = a - jnp.max(a, axis=1, keepdims=True)
    ea = jnp.exp(a)
    inv_den = pl.reciprocal(jnp.sum(ea, axis=1, keepdims=True), approx=True)
    xvt = xvt * (ea * inv_den)

    # fc1 (BN1 folded into weight/bias) -> leaky_relu -> dropout(identity in eval mode)
    h = jnp.dot(xvt.astype(bf16), w1_ref[...], preferred_element_type=f32) + b1_ref[...]
    h = _leaky_relu(h)

    # fc2 (BN2 folded) -> leaky_relu -> dropout(identity)
    h = jnp.dot(h.astype(bf16), w2_ref[...], preferred_element_type=f32) + b2_ref[...]
    h = _leaky_relu(h)

    # classifier (256 -> 1) as a lane reduction (avoids a 1-wide MXU matmul) -> sigmoid
    logit = jnp.sum(h * wc_ref[...], axis=1, keepdims=True) + bc_ref[...]
    out_ref[...] = jax.nn.sigmoid(logit)


# ---------------------------------------------------------------------------
# Parameters (PyTorch-default-style init) and host-side folding / casting
# ---------------------------------------------------------------------------
def init_params(key):
    """Deterministic init mimicking PyTorch nn.Linear defaults (U(-1/sqrt(fan_in), ...))."""
    def linear(k, fan_in, fan_out):
        kw, kb = jax.random.split(k)
        bound = 1.0 / math.sqrt(fan_in)
        w = jax.random.uniform(kw, (fan_in, fan_out), jnp.float32, -bound, bound)  # [in, out]
        b = jax.random.uniform(kb, (1, fan_out), jnp.float32, -bound, bound)
        return w, b

    ks = jax.random.split(key, 6)
    p = {}
    p["wv"], p["bv"] = linear(ks[0], 512, 256)   # vision_projection
    p["wt"], p["bt"] = linear(ks[1], 768, 256)   # text_projection
    p["wa"], p["ba"] = linear(ks[2], 256, 256)   # attention
    p["w1"], p["b1"] = linear(ks[3], 256, 512)   # fc1
    p["w2"], p["b2"] = linear(ks[4], 512, 256)   # fc2
    p["wc"], p["bc"] = linear(ks[5], 256, 1)     # classifier

    # BatchNorm1d eval-mode fold: scale = gamma / sqrt(var + eps), shift = beta - mean * scale
    # (freshly initialized BN: gamma=1, beta=0, running_mean=0, running_var=1)
    eps = 1e-5
    p["s1"] = jnp.full((1, 512), 1.0 / math.sqrt(1.0 + eps), jnp.float32)
    p["h1"] = jnp.zeros((1, 512), jnp.float32)
    p["s2"] = jnp.full((1, 256), 1.0 / math.sqrt(1.0 + eps), jnp.float32)
    p["h2"] = jnp.zeros((1, 256), jnp.float32)
    return p


def prepare_kernel_params(p):
    """Fold BN into fc1/fc2 and cast MXU weight matrices to bf16 (biases stay f32)."""
    kp = {}
    kp["wv"] = p["wv"].astype(jnp.bfloat16)
    kp["bv"] = p["bv"]
    kp["wt"] = p["wt"].astype(jnp.bfloat16)
    kp["bt"] = p["bt"]
    kp["wa"] = p["wa"].astype(jnp.bfloat16)
    kp["ba"] = p["ba"]
    kp["w1"] = (p["w1"] * p["s1"]).astype(jnp.bfloat16)   # column-wise BN scale fold
    kp["b1"] = p["b1"] * p["s1"] + p["h1"]
    kp["w2"] = (p["w2"] * p["s2"]).astype(jnp.bfloat16)
    kp["b2"] = p["b2"] * p["s2"] + p["h2"]
    kp["wc"] = p["wc"].reshape(1, 256)                    # classifier as a row (f32, VPU path)
    kp["bc"] = p["bc"].reshape(1, 1)
    return kp


# ---------------------------------------------------------------------------
# Wrapper
# ---------------------------------------------------------------------------
def early_fusion_forward(image_emb, text_emb, kp, max_tile=512):
    B = image_emb.shape[0]
    F_img = image_emb.shape[1]
    F_txt = text_emb.shape[1]

    TB = min(max_tile, _round_up(B, 8))       # f32 sublane multiple; MXU-friendly at 512
    Bp = _round_up(B, TB)
    if Bp != B:
        pad = Bp - B
        image_emb = jnp.pad(image_emb, ((0, pad), (0, 0)))
        text_emb = jnp.pad(text_emb, ((0, pad), (0, 0)))

    args = (image_emb, text_emb,
            kp["wv"], kp["bv"], kp["wt"], kp["bt"],
            kp["wa"], kp["ba"], kp["w1"], kp["b1"],
            kp["w2"], kp["b2"], kp["wc"], kp["bc"])

    def batch_spec(feat):
        return pl.BlockSpec((TB, feat), lambda i: (i, 0))

    def const_spec(shape):
        return pl.BlockSpec(shape, lambda i: (0, 0))       # stays VMEM-resident across steps

    in_specs = [batch_spec(F_img), batch_spec(F_txt)]
    in_specs += [const_spec(a.shape) for a in args[2:]]

    out = pl.pallas_call(
        efnet_kernel,
        out_shape=jax.ShapeDtypeStruct((Bp, 1), jnp.float32),
        grid=(Bp // TB,),
        in_specs=in_specs,
        out_specs=pl.BlockSpec((TB, 1), lambda i: (i, 0)),
        compiler_params=pltpu.CompilerParams(
            dimension_semantics=("parallel",),
            vmem_limit_bytes=48 * 1024 * 1024,
        ),
    )(*args)
    return out[:B]


# ---------------------------------------------------------------------------
# Plain-JAX reference (original f32 eval-mode semantics) for validation
# ---------------------------------------------------------------------------
def reference_forward(image_emb, text_emb, p):
    def l2n(x, eps=1e-12):
        n = jnp.sqrt(jnp.sum(x * x, axis=1, keepdims=True))
        return x / jnp.maximum(n, eps)

    x1 = l2n(image_emb)
    xv = _leaky_relu(x1 @ p["wv"] + p["bv"])
    x2 = l2n(text_emb)
    xt = _leaky_relu(x2 @ p["wt"] + p["bt"])
    xvt = xv * xt
    attn = jax.nn.softmax(xvt @ p["wa"] + p["ba"], axis=1)
    xvt = xvt * attn
    h = _leaky_relu((xvt @ p["w1"] + p["b1"]) * p["s1"] + p["h1"])
    h = _leaky_relu((h @ p["w2"] + p["b2"]) * p["s2"] + p["h2"])
    return jax.nn.sigmoid(h @ p["wc"] + p["bc"])


if __name__ == "__main__":
    key = jax.random.PRNGKey(0)
    k_img, k_txt, k_par = jax.random.split(key, 3)

    B = 8
    image_emb = jax.random.normal(k_img, (B, 512), jnp.float32)
    text_emb = jax.random.normal(k_txt, (B, 768), jnp.float32)

    params = init_params(k_par)
    kparams = prepare_kernel_params(params)

    out = early_fusion_forward(image_emb, text_emb, kparams)
    out = jax.block_until_ready(out)

    ref = reference_forward(image_emb, text_emb, params)
    assert out.shape == (B, 1), f"bad output shape {out.shape}"
    # bf16 MXU weights + approx reciprocal vs full-f32 reference -> loose tolerance
    assert jnp.allclose(out, ref, atol=2e-2, rtol=0), (
        f"mismatch vs reference: max abs err {float(jnp.max(jnp.abs(out - ref)))}")

    print("KERNEL_OK")
</pallas_src>

<mosaic_0001>
module attributes {stable_mosaic.version = 11 : i64} {
  func.func @efnet_kernel(%arg0: i32, %arg1: memref<8x512xf32, #tpu.memory_space<vmem>>, %arg2: memref<8x768xf32, #tpu.memory_space<vmem>>, %arg3: memref<512x256xbf16, #tpu.memory_space<vmem>>, %arg4: memref<1x256xf32, #tpu.memory_space<vmem>>, %arg5: memref<768x256xbf16, #tpu.memory_space<vmem>>, %arg6: memref<1x256xf32, #tpu.memory_space<vmem>>, %arg7: memref<256x256xbf16, #tpu.memory_space<vmem>>, %arg8: memref<1x256xf32, #tpu.memory_space<vmem>>, %arg9: memref<256x512xbf16, #tpu.memory_space<vmem>>, %arg10: memref<1x512xf32, #tpu.memory_space<vmem>>, %arg11: memref<512x256xbf16, #tpu.memory_space<vmem>>, %arg12: memref<1x256xf32, #tpu.memory_space<vmem>>, %arg13: memref<1x256xf32, #tpu.memory_space<vmem>>, %arg14: memref<1x1xf32, #tpu.memory_space<vmem>>, %arg15: memref<8x1xf32, #tpu.memory_space<vmem>>) attributes {dimension_semantics = [#tpu.dimension_semantics<parallel>], iteration_bounds = array<i64: 1>, scalar_prefetch = 0 : i64, scratch_operands = 0 : i64, tpu.core_type = #tpu.core_type<tc>, window_params = [{transform_indices = @transform_0, window_bounds = array<i64: 8, 512>}, {transform_indices = @transform_1, window_bounds = array<i64: 8, 768>}, {pipeline_mode = #tpu.pipeline_mode<synchronous>, transform_indices = @transform_2, window_bounds = array<i64: 512, 256>}, {pipeline_mode = #tpu.pipeline_mode<synchronous>, transform_indices = @transform_3, window_bounds = array<i64: 1, 256>}, {pipeline_mode = #tpu.pipeline_mode<synchronous>, transform_indices = @transform_4, window_bounds = array<i64: 768, 256>}, {pipeline_mode = #tpu.pipeline_mode<synchronous>, transform_indices = @transform_5, window_bounds = array<i64: 1, 256>}, {pipeline_mode = #tpu.pipeline_mode<synchronous>, transform_indices = @transform_6, window_bounds = array<i64: 256, 256>}, {pipeline_mode = #tpu.pipeline_mode<synchronous>, transform_indices = @transform_7, window_bounds = array<i64: 1, 256>}, {pipeline_mode = #tpu.pipeline_mode<synchronous>, transform_indices = @transform_8, window_bounds = array<i64: 256, 512>}, {pipeline_mode = #tpu.pipeline_mode<synchronous>, transform_indices = @transform_9, window_bounds = array<i64: 1, 512>}, {pipeline_mode = #tpu.pipeline_mode<synchronous>, transform_indices = @transform_10, window_bounds = array<i64: 512, 256>}, {pipeline_mode = #tpu.pipeline_mode<synchronous>, transform_indices = @transform_11, window_bounds = array<i64: 1, 256>}, {pipeline_mode = #tpu.pipeline_mode<synchronous>, transform_indices = @transform_12, window_bounds = array<i64: 1, 256>}, {pipeline_mode = #tpu.pipeline_mode<synchronous>, transform_indices = @transform_13, window_bounds = array<i64: 1, 1>}, {transform_indices = @transform_14, window_bounds = array<i64: 8, 1>}]} {
    %c0 = arith.constant 0 : index
    %c0_0 = arith.constant 0 : index
    %0 = vector.load %arg1[%c0, %c0_0] : memref<8x512xf32, #tpu.memory_space<vmem>>, vector<8x512xf32>
    %1 = arith.mulf %0, %0 : vector<8x512xf32>
    %cst = arith.constant dense<0.000000e+00> : vector<8xf32>
    %2 = vector.multi_reduction <add>, %1, %cst [1] : vector<8x512xf32> to vector<8xf32>
    %3 = vector.shape_cast %2 : vector<8xf32> to vector<8x1xf32>
    %cst_1 = arith.constant 1.000000e-24 : f32
    %4 = vector.broadcast %cst_1 : f32 to vector<8x1xf32>
    %5 = arith.maximumf %3, %4 : vector<8x1xf32>
    %6 = math.rsqrt %5 : vector<8x1xf32>
    %7 = vector.broadcast %6 : vector<8x1xf32> to vector<8x512xf32>
    %8 = arith.mulf %0, %7 : vector<8x512xf32>
    %9 = arith.truncf %8 : vector<8x512xf32> to vector<8x512xbf16>
    %c0_2 = arith.constant 0 : index
    %c0_3 = arith.constant 0 : index
    %10 = vector.load %arg3[%c0_2, %c0_3] : memref<512x256xbf16, #tpu.memory_space<vmem>>, vector<512x256xbf16>
    %cst_4 = arith.constant dense<0.000000e+00> : vector<8x256xf32>
    %11 = tpu.matmul %9, %10, %cst_4 {dimension_numbers = #tpu.dot_dimension_numbers<[1], [0], [0], [1], [0, 0, 1, 1], [], []>} : vector<8x512xbf16>, vector<512x256xbf16>, vector<8x256xf32> -> vector<8x256xf32>
    %c0_5 = arith.constant 0 : index
    %c0_6 = arith.constant 0 : index
    %12 = vector.load %arg4[%c0_5, %c0_6] : memref<1x256xf32, #tpu.memory_space<vmem>>, vector<1x256xf32>
    %13 = vector.broadcast %12 : vector<1x256xf32> to vector<8x256xf32>
    %14 = arith.addf %11, %13 : vector<8x256xf32>
    %cst_7 = arith.constant 0.000000e+00 : f32
    %15 = vector.broadcast %cst_7 : f32 to vector<8x256xf32>
    %16 = arith.cmpf oge, %14, %15 : vector<8x256xf32>
    %cst_8 = arith.constant 0.00999999977 : f32
    %17 = vector.broadcast %cst_8 : f32 to vector<8x256xf32>
    %18 = arith.mulf %17, %14 : vector<8x256xf32>
    %19 = arith.select %16, %14, %18 : vector<8x256xi1>, vector<8x256xf32>
    %c0_9 = arith.constant 0 : index
    %c0_10 = arith.constant 0 : index
    %20 = vector.load %arg2[%c0_9, %c0_10] : memref<8x768xf32, #tpu.memory_space<vmem>>, vector<8x768xf32>
    %21 = arith.mulf %20, %20 : vector<8x768xf32>
    %cst_11 = arith.constant dense<0.000000e+00> : vector<8xf32>
    %22 = vector.multi_reduction <add>, %21, %cst_11 [1] : vector<8x768xf32> to vector<8xf32>
    %23 = vector.shape_cast %22 : vector<8xf32> to vector<8x1xf32>
    %cst_12 = arith.constant 1.000000e-24 : f32
    %24 = vector.broadcast %cst_12 : f32 to vector<8x1xf32>
    %25 = arith.maximumf %23, %24 : vector<8x1xf32>
    %26 = math.rsqrt %25 : vector<8x1xf32>
    %27 = vector.broadcast %26 : vector<8x1xf32> to vector<8x768xf32>
    %28 = arith.mulf %20, %27 : vector<8x768xf32>
    %29 = arith.truncf %28 : vector<8x768xf32> to vector<8x768xbf16>
    %c0_13 = arith.constant 0 : index
    %c0_14 = arith.constant 0 : index
    %30 = vector.load %arg5[%c0_13, %c0_14] : memref<768x256xbf16, #tpu.memory_space<vmem>>, vector<768x256xbf16>
    %cst_15 = arith.constant dense<0.000000e+00> : vector<8x256xf32>
    %31 = tpu.matmul %29, %30, %cst_15 {dimension_numbers = #tpu.dot_dimension_numbers<[1], [0], [0], [1], [0, 0, 1, 1], [], []>} : vector<8x768xbf16>, vector<768x256xbf16>, vector<8x256xf32> -> vector<8x256xf32>
    %c0_16 = arith.constant 0 : index
    %c0_17 = arith.constant 0 : index
    %32 = vector.load %arg6[%c0_16, %c0_17] : memref<1x256xf32, #tpu.memory_space<vmem>>, vector<1x256xf32>
    %33 = vector.broadcast %32 : vector<1x256xf32> to vector<8x256xf32>
    %34 = arith.addf %31, %33 : vector<8x256xf32>
    %cst_18 = arith.constant 0.000000e+00 : f32
    %35 = vector.broadcast %cst_18 : f32 to vector<8x256xf32>
    %36 = arith.cmpf oge, %34, %35 : vector<8x256xf32>
    %cst_19 = arith.constant 0.00999999977 : f32
    %37 = vector.broadcast %cst_19 : f32 to vector<8x256xf32>
    %38 = arith.mulf %37, %34 : vector<8x256xf32>
    %39 = arith.select %36, %34, %38 : vector<8x256xi1>, vector<8x256xf32>
    %40 = arith.mulf %19, %39 : vector<8x256xf32>
    %41 = arith.truncf %40 : vector<8x256xf32> to vector<8x256xbf16>
    %c0_20 = arith.constant 0 : index
    %c0_21 = arith.constant 0 : index
    %42 = vector.load %arg7[%c0_20, %c0_21] : memref<256x256xbf16, #tpu.memory_space<vmem>>, vector<256x256xbf16>
    %cst_22 = arith.constant dense<0.000000e+00> : vector<8x256xf32>
    %43 = tpu.matmul %41, %42, %cst_22 {dimension_numbers = #tpu.dot_dimension_numbers<[1], [0], [0], [1], [0, 0, 1, 1], [], []>} : vector<8x256xbf16>, vector<256x256xbf16>, vector<8x256xf32> -> vector<8x256xf32>
    %c0_23 = arith.constant 0 : index
    %c0_24 = arith.constant 0 : index
    %44 = vector.load %arg8[%c0_23, %c0_24] : memref<1x256xf32, #tpu.memory_space<vmem>>, vector<1x256xf32>
    %45 = vector.broadcast %44 : vector<1x256xf32> to vector<8x256xf32>
    %46 = arith.addf %43, %45 : vector<8x256xf32>
    %cst_25 = arith.constant dense<0xFF800000> : vector<8xf32>
    %47 = vector.multi_reduction <maximumf>, %46, %cst_25 [1] : vector<8x256xf32> to vector<8xf32>
    %48 = vector.shape_cast %47 : vector<8xf32> to vector<8x1xf32>
    %49 = vector.broadcast %48 : vector<8x1xf32> to vector<8x256xf32>
    %50 = arith.subf %46, %49 : vector<8x256xf32>
    %51 = math.exp %50 : vector<8x256xf32>
    %cst_26 = arith.constant dense<0.000000e+00> : vector<8xf32>
    %52 = vector.multi_reduction <add>, %51, %cst_26 [1] : vector<8x256xf32> to vector<8xf32>
    %53 = vector.shape_cast %52 : vector<8xf32> to vector<8x1xf32>
    %54 = tpu.reciprocal %53 {approx = true} : vector<8x1xf32> -> vector<8x1xf32>
    %55 = vector.broadcast %54 : vector<8x1xf32> to vector<8x256xf32>
    %56 = arith.mulf %51, %55 : vector<8x256xf32>
    %57 = arith.mulf %40, %56 : vector<8x256xf32>
    %58 = arith.truncf %57 : vector<8x256xf32> to vector<8x256xbf16>
    %c0_27 = arith.constant 0 : index
    %c0_28 = arith.constant 0 : index
    %59 = vector.load %arg9[%c0_27, %c0_28] : memref<256x512xbf16, #tpu.memory_space<vmem>>, vector<256x512xbf16>
    %cst_29 = arith.constant dense<0.000000e+00> : vector<8x512xf32>
    %60 = tpu.matmul %58, %59, %cst_29 {dimension_numbers = #tpu.dot_dimension_numbers<[1], [0], [0], [1], [0, 0, 1, 1], [], []>} : vector<8x256xbf16>, vector<256x512xbf16>, vector<8x512xf32> -> vector<8x512xf32>
    %c0_30 = arith.constant 0 : index
    %c0_31 = arith.constant 0 : index
    %61 = vector.load %arg10[%c0_30, %c0_31] : memref<1x512xf32, #tpu.memory_space<vmem>>, vector<1x512xf32>
    %62 = vector.broadcast %61 : vector<1x512xf32> to vector<8x512xf32>
    %63 = arith.addf %60, %62 : vector<8x512xf32>
    %cst_32 = arith.constant 0.000000e+00 : f32
    %64 = vector.broadcast %cst_32 : f32 to vector<8x512xf32>
    %65 = arith.cmpf oge, %63, %64 : vector<8x512xf32>
    %cst_33 = arith.constant 0.00999999977 : f32
    %66 = vector.broadcast %cst_33 : f32 to vector<8x512xf32>
    %67 = arith.mulf %66, %63 : vector<8x512xf32>
    %68 = arith.select %65, %63, %67 : vector<8x512xi1>, vector<8x512xf32>
    %69 = arith.truncf %68 : vector<8x512xf32> to vector<8x512xbf16>
    %c0_34 = arith.constant 0 : index
    %c0_35 = arith.constant 0 : index
    %70 = vector.load %arg11[%c0_34, %c0_35] : memref<512x256xbf16, #tpu.memory_space<vmem>>, vector<512x256xbf16>
    %cst_36 = arith.constant dense<0.000000e+00> : vector<8x256xf32>
    %71 = tpu.matmul %69, %70, %cst_36 {dimension_numbers = #tpu.dot_dimension_numbers<[1], [0], [0], [1], [0, 0, 1, 1], [], []>} : vector<8x512xbf16>, vector<512x256xbf16>, vector<8x256xf32> -> vector<8x256xf32>
    %c0_37 = arith.constant 0 : index
    %c0_38 = arith.constant 0 : index
    %72 = vector.load %arg12[%c0_37, %c0_38] : memref<1x256xf32, #tpu.memory_space<vmem>>, vector<1x256xf32>
    %73 = vector.broadcast %72 : vector<1x256xf32> to vector<8x256xf32>
    %74 = arith.addf %71, %73 : vector<8x256xf32>
    %cst_39 = arith.constant 0.000000e+00 : f32
    %75 = vector.broadcast %cst_39 : f32 to vector<8x256xf32>
    %76 = arith.cmpf oge, %74, %75 : vector<8x256xf32>
    %cst_40 = arith.constant 0.00999999977 : f32
    %77 = vector.broadcast %cst_40 : f32 to vector<8x256xf32>
    %78 = arith.mulf %77, %74 : vector<8x256xf32>
    %79 = arith.select %76, %74, %78 : vector<8x256xi1>, vector<8x256xf32>
    %c0_41 = arith.constant 0 : index
    %c0_42 = arith.constant 0 : index
    %80 = vector.load %arg13[%c0_41, %c0_42] : memref<1x256xf32, #tpu.memory_space<vmem>>, vector<1x256xf32>
    %81 = vector.broadcast %80 : vector<1x256xf32> to vector<8x256xf32>
    %82 = arith.mulf %79, %81 : vector<8x256xf32>
    %cst_43 = arith.constant dense<0.000000e+00> : vector<8xf32>
    %83 = vector.multi_reduction <add>, %82, %cst_43 [1] : vector<8x256xf32> to vector<8xf32>
    %84 = vector.shape_cast %83 : vector<8xf32> to vector<8x1xf32>
    %c0_44 = arith.constant 0 : index
    %c0_45 = arith.constant 0 : index
    %85 = vector.load %arg14[%c0_44, %c0_45] : memref<1x1xf32, #tpu.memory_space<vmem>>, vector<1x1xf32>
    %86 = vector.broadcast %85 : vector<1x1xf32> to vector<8x1xf32>
    %87 = arith.addf %84, %86 : vector<8x1xf32>
    %88 = arith.negf %87 : vector<8x1xf32>
    %89 = math.exp %88 : vector<8x1xf32>
    %cst_46 = arith.constant 1.000000e+00 : f32
    %90 = vector.broadcast %cst_46 : f32 to vector<8x1xf32>
    %91 = arith.addf %90, %89 : vector<8x1xf32>
    %92 = arith.divf %90, %91 : vector<8x1xf32>
    %c0_47 = arith.constant 0 : index
    %c0_48 = arith.constant 0 : index
    %93 = vector.load %arg15[%c0_47, %c0_48] : memref<8x1xf32, #tpu.memory_space<vmem>>, vector<8x1xf32>
    tpu.vector_store %arg15[%c0_47, %c0_48], %92 {strides = array<i32>} : memref<8x1xf32, #tpu.memory_space<vmem>>, vector<8x1xf32>,
    return
  }
  func.func @transform_0(%arg0: i32) -> (i32, i32) {
    %c0_i32 = arith.constant 0 : i32
    %c0_i32_0 = arith.constant 0 : i32
    return %arg0, %c0_i32 : i32, i32
  }
  func.func @transform_1(%arg0: i32) -> (i32, i32) {
    %c0_i32 = arith.constant 0 : i32
    %c0_i32_0 = arith.constant 0 : i32
    return %arg0, %c0_i32 : i32, i32
  }
  func.func @transform_2(%arg0: i32) -> (i32, i32) {
    %c0_i32 = arith.constant 0 : i32
    %c0_i32_0 = arith.constant 0 : i32
    %c0_i32_1 = arith.constant 0 : i32
    return %c0_i32, %c0_i32_0 : i32, i32
  }
  func.func @transform_3(%arg0: i32) -> (i32, i32) {
    %c0_i32 = arith.constant 0 : i32
    %c0_i32_0 = arith.constant 0 : i32
    %c0_i32_1 = arith.constant 0 : i32
    return %c0_i32, %c0_i32_0 : i32, i32
  }
  func.func @transform_4(%arg0: i32) -> (i32, i32) {
    %c0_i32 = arith.constant 0 : i32
    %c0_i32_0 = arith.constant 0 : i32
    %c0_i32_1 = arith.constant 0 : i32
    return %c0_i32, %c0_i32_0 : i32, i32
  }
  func.func @transform_5(%arg0: i32) -> (i32, i32) {
    %c0_i32 = arith.constant 0 : i32
    %c0_i32_0 = arith.constant 0 : i32
    %c0_i32_1 = arith.constant 0 : i32
    return %c0_i32, %c0_i32_0 : i32, i32
  }
  func.func @transform_6(%arg0: i32) -> (i32, i32) {
    %c0_i32 = arith.constant 0 : i32
    %c0_i32_0 = arith.constant 0 : i32
    %c0_i32_1 = arith.constant 0 : i32
    return %c0_i32, %c0_i32_0 : i32, i32
  }
  func.func @transform_7(%arg0: i32) -> (i32, i32) {
    %c0_i32 = arith.constant 0 : i32
    %c0_i32_0 = arith.constant 0 : i32
    %c0_i32_1 = arith.constant 0 : i32
    return %c0_i32, %c0_i32_0 : i32, i32
  }
  func.func @transform_8(%arg0: i32) -> (i32, i32) {
    %c0_i32 = arith.constant 0 : i32
    %c0_i32_0 = arith.constant 0 : i32
    %c0_i32_1 = arith.constant 0 : i32
    return %c0_i32, %c0_i32_0 : i32, i32
  }
  func.func @transform_9(%arg0: i32) -> (i32, i32) {
    %c0_i32 = arith.constant 0 : i32
    %c0_i32_0 = arith.constant 0 : i32
    %c0_i32_1 = arith.constant 0 : i32
    return %c0_i32, %c0_i32_0 : i32, i32
  }
  func.func @transform_10(%arg0: i32) -> (i32, i32) {
    %c0_i32 = arith.constant 0 : i32
    %c0_i32_0 = arith.constant 0 : i32
    %c0_i32_1 = arith.constant 0 : i32
    return %c0_i32, %c0_i32_0 : i32, i32
  }
  func.func @transform_11(%arg0: i32) -> (i32, i32) {
    %c0_i32 = arith.constant 0 : i32
    %c0_i32_0 = arith.constant 0 : i32
    %c0_i32_1 = arith.constant 0 : i32
    return %c0_i32, %c0_i32_0 : i32, i32
  }
  func.func @transform_12(%arg0: i32) -> (i32, i32) {
    %c0_i32 = arith.constant 0 : i32
    %c0_i32_0 = arith.constant 0 : i32
    %c0_i32_1 = arith.constant 0 : i32
    return %c0_i32, %c0_i32_0 : i32, i32
  }
  func.func @transform_13(%arg0: i32) -> (i32, i32) {
    %c0_i32 = arith.constant 0 : i32
    %c0_i32_0 = arith.constant 0 : i32
    %c0_i32_1 = arith.constant 0 : i32
    return %c0_i32, %c0_i32_0 : i32, i32
  }
  func.func @transform_14(%arg0: i32) -> (i32, i32) {
    %c0_i32 = arith.constant 0 : i32
    %c0_i32_0 = arith.constant 0 : i32
    return %arg0, %c0_i32 : i32, i32
  }
}

</mosaic_0001>

<bundles_post_ra>
// kernel: tpu_custom_call.1
= control target key start
LH: loop header
LB: loop body
LE: loop exit
PB: predicated region body
PF: predicated region fallthrough
CT: control target
= control target key end

     0   :  { %s4968_s0 = inlined_call_operand.hbm [shape: f32[8,512], index: 0, kind: input, shape index: {}]   ;;  %s4969_s1 = inlined_call_operand.hbm [shape: f32[8,768], index: 1, kind: input, shape index: {}]   ;;  %s4970_s2 = inlined_call_operand.hbm [shape: bf16[512,256], index: 2, kind: input, shape index: {}]   ;;  %s4971_s3 = inlined_call_operand.vmem [shape: f32[1,256], index: 3, kind: input, shape index: {}]   ;;  %s4972_s4 = inlined_call_operand.hbm [shape: bf16[768,256], index: 4, kind: input, shape index: {}]   ;;  %s4973_s5 = inlined_call_operand.hbm [shape: f32[1,256], index: 5, kind: input, shape index: {}]   ;;  %s4974_s6 = inlined_call_operand.hbm [shape: bf16[256,256], index: 6, kind: input, shape index: {}]   ;;  %s4975_s7 = inlined_call_operand.vmem [shape: f32[1,256], index: 7, kind: input, shape index: {}]   ;;  %s4976_s8 = inlined_call_operand.hbm [shape: bf16[256,512], index: 8, kind: input, shape index: {}]   ;;  %s4977_s9 = inlined_call_operand.vmem [shape: f32[1,512], index: 9, kind: input, shape index: {}]   ;;  %s4978_s10 = inlined_call_operand.hbm [shape: bf16[512,256], index: 10, kind: input, shape index: {}]   ;;  %s4979_s11 = inlined_call_operand.vmem [shape: f32[1,256], index: 11, kind: input, shape index: {}]   ;;  %s4980_s12 = inlined_call_operand.vmem [shape: f32[1,256], index: 12, kind: input, shape index: {}]   ;;  %s4981_s13 = inlined_call_operand.<no memory space> [shape: f32[1,1], index: 13, kind: input, shape index: {}]   ;;  %s4982_s14 = inlined_call_operand.vmem [shape: f32[8,1], index: 14, kind: output, shape index: {}]  }
   0x1   :  { %v19_v0 = vstv %s4981_s13 }
   0x2   :  { %20 = vst [vmem:[#allocation2] sm:$0x1] %v19_v0 }
   0x3   :  { %21 = vsyncpa [#allocation4], 0 }
   0x4   :  { %22 = vsyncpa [#allocation6], 0 }
   0x5   :  { %23 = vsyncpa [#allocation9], 0 }
   0x6   :  { %24 = vsyncpa [#allocation12], 0  ;;  %s42_s17 = sshll.u32 %s4969_s1, 4  ;;  %s43_s17 = int_to_ptr.hbm [resolvable:$true] %s42_s17 }
   0x7   :  { %25 = vsyncpa [#allocation15], 0  ;;  %s4651_s18 = smov [#allocation5]   ;;  %s67_s22 = sshll.u32 %s4972_s4, 4  ;;  %s68_s22 = int_to_ptr.hbm [resolvable:$true] %s67_s22 }
   0x8   :  { %s44_s19 = sshll.u32 %s4651_s18, 4  ;;  %s4652_s13 = smov [#allocation8]   ;;  %s45_s19 = int_to_ptr.vmem [resolvable:$true] %s44_s19 }
   0x9   :  { %47 = dma.hbm_to_vmem [thread:$0]  %s43_s17, 768, %s45_s19, [#allocation6]  }
   0xa   :  { %s69_s23 = sshll.u32 %s4652_s13, 4  ;;  %s91_s26 = sshll.u32 %s4974_s6, 4  ;;  %s70_s23 = int_to_ptr.vmem [resolvable:$true] %s69_s23  ;;  %s92_s26 = int_to_ptr.hbm [resolvable:$true] %s91_s26 }
   0xb   :  { %s4653_s1 = smov 128   ;;  %s4654_s27 = smov 8  }
   0xc   :  { %75 = dma.hbm_to_vmem [thread:$0]  %s68_s22, 12288, %s70_s23, [#allocation9], %s4653_s1, %s4653_s1, %s4654_s27  }
   0xd   :  { %s31_s30 = sshll.u32 %s4968_s0, 4  ;;  %s4655_s4 = smov [#allocation11]   ;;  %s32_s30 = int_to_ptr.hbm [resolvable:$true] %s31_s30 }
   0xe   :  { %s93_s15 = sshll.u32 %s4655_s4, 4  ;;  %s4656_s6 = smov [#allocation3]   ;;  %s94_s15 = int_to_ptr.vmem [resolvable:$true] %s93_s15 }
   0xf   :  { %99 = dma.hbm_to_vmem [thread:$0]  %s92_s26, 4096, %s94_s15, [#allocation12], %s4653_s1, %s4653_s1, %s4654_s27  }
  0x10   :  { %s33_s16 = sshll.u32 %s4656_s6, 4  ;;  %s52_s19 = sshll.u32 %s4970_s2, 4  ;;  %s34_s16 = int_to_ptr.vmem [resolvable:$true] %s33_s16  ;;  %s53_s19 = int_to_ptr.hbm [resolvable:$true] %s52_s19 }
  0x11   :  { %36 = dma.hbm_to_vmem [thread:$0]  %s32_s30, 512, %s34_s16, [#allocation4]  }
  0x12   :  { %s81_s0 = sshll.u32 %s4973_s5, 4  ;;  %s4657_s22 = smov [#allocation7]   ;;  %s82_s0 = int_to_ptr.hbm [resolvable:$true] %s81_s0 }
  0x13   :  { %s54_s13 = sshll.u32 %s4657_s22, 4  ;;  %s4658_s23 = smov [#allocation10]   ;;  %s55_s13 = int_to_ptr.vmem [resolvable:$true] %s54_s13 }
  0x14   :  { %60 = dma.hbm_to_vmem [thread:$0]  %s53_s19, 8192, %s55_s13, [#allocation6], %s4653_s1, %s4653_s1, %s4654_s27  }
  0x15   :  { %s83_s24 = sshll.u32 %s4658_s23, 4  ;;  %s106_s2 = sshll.u32 %s4976_s8, 4  ;;  %s84_s24 = int_to_ptr.vmem [resolvable:$true] %s83_s24  ;;  %s107_s2 = int_to_ptr.hbm [resolvable:$true] %s106_s2 }
  0x16   :  { %86 = dma.hbm_to_vmem [thread:$0]  %s82_s0, 32, %s84_s24, [#allocation9]  }
  0x17   :  { %s4659_s28 = smov [#allocation13]   ;;  %s121_s4 = sshll.u32 %s4978_s10, 4  ;;  %s122_s4 = int_to_ptr.hbm [resolvable:$true] %s121_s4 }
  0x18   :  { %s108_s29 = sshll.u32 %s4659_s28, 4  ;;  %s4660_s15 = smov 256   ;;  %s109_s29 = int_to_ptr.vmem [resolvable:$true] %s108_s29 }
  0x19   :  { %s4661_s6 = smov 16   ;;  %s4662_s16 = smov [#allocation14]  }
  0x1a   :  { %114 = dma.hbm_to_vmem [thread:$0]  %s107_s2, 8192, %s109_s29, [#allocation12], %s4660_s15, %s4660_s15, %s4661_s6  }
  0x1b   :  { %s123_s17 = sshll.u32 %s4662_s16, 4  ;;  %s124_s17 = int_to_ptr.vmem [resolvable:$true] %s123_s17 }
  0x1c   :  { %129 = dma.hbm_to_vmem [thread:$0]  %s122_s4, 8192, %s124_s17, [#allocation15], %s4653_s1, %s4653_s1, %s4654_s27  }
  0x1d   :  { %4641 = dma.done.wait [#allocation4], 512  }
  0x1e   :  { %4642 = vsyncadd [#allocation4], 4294966784 }
  0x1f   :  { %4643 = dma.done.wait [#allocation6], 8960  }
  0x20   :  { %4644 = vsyncadd [#allocation6], 4294958336 }
  0x21   :  { %4645 = dma.done.wait [#allocation9], 12320  }
  0x22   :  { %4646 = vsyncadd [#allocation9], 4294954976 }
  0x23   :  { %4647 = dma.done.wait [#allocation12], 12288  }
  0x24   :  { %4648 = vsyncadd [#allocation12], 4294955008 }
  0x25   :  { %4649 = dma.done.wait [#allocation15], 8192  }
  0x26   :  { %4650 = vsyncadd [#allocation15], 4294959104  ;;  %v4777_v1 = vld [vmem:[#allocation3] sm:$0xff]  ;;  %v4779_v2 = vld [vmem:[#allocation3 + $0x8] sm:$0xff] }
  0x27   :  { %v4781_v3 = vld [vmem:[#allocation3 + $0x10] sm:$0xff]  ;;  %v4783_v4 = vld [vmem:[#allocation3 + $0x18] sm:$0xff]  ;;  %v172_v5 = vmul.f32 %v4777_v1, %v4777_v1  ;;  %v173_v6 = vmul.f32 %v4779_v2, %v4779_v2  ;;  %v4791_v8 = vld [vmem:[#allocation5] sm:$0xff] }
  0x28   :  { %v174_v7 = vmul.f32 %v4781_v3, %v4781_v3  ;;  %v4793_v9 = vld [vmem:[#allocation5 + $0x8] sm:$0xff]  ;;  %v4795_v10 = vld [vmem:[#allocation5 + $0x10] sm:$0xff]  ;;  %v4797_v11 = vld [vmem:[#allocation5 + $0x18] sm:$0xff]  ;;  %v706_v12 = vmul.f32 %v4791_v8, %v4791_v8  ;;  %v175_v14 = vmul.f32 %v4783_v4, %v4783_v4 }
  0x29   :  { %v707_v13 = vmul.f32 %v4793_v9, %v4793_v9  ;;  %v176_v15 = vadd.f32 %v173_v6, %v172_v5  ;;  %v704_v16 = vld [vmem:[#allocation5 + $0x20] sm:$0xff]  ;;  %v708_v17 = vmul.f32 %v4795_v10, %v4795_v10  ;;  %v4115_v19 = vld [vmem:[#allocation7 + $0x74] sm:$0xf0]  ;;  %v709_v21 = vmul.f32 %v4797_v11, %v4797_v11  ;;  %v2869_v36 = vld [vmem:[#allocation7 + $0x60] sm:$0xf] }
  0x2a   :  { %v2877_v18 = vld [vmem:[#allocation7 + $0x70] sm:$0xf]  ;;  %v705_v20 = vld [vmem:[#allocation5 + $0x28] sm:$0xff]  ;;  %v710_v32 = vmul.f32 %v704_v16, %v704_v16  ;;  %v4113_v37 = vld [vmem:[#allocation7 + $0x64] sm:$0xf0] }
  0x2b   :  { %v712_v22 = vadd.f32 %v707_v13, %v706_v12  ;;  %v2878_v23 = vor.u32 %v4115_v19, %v2877_v18  ;;  %v2941_v24 = vld [vmem:[#allocation7 + $0xf0] sm:$0xf]  ;;  %v4131_v25 = vld [vmem:[#allocation7 + $0xf4] sm:$0xf0]  ;;  %v177_v27 = vadd.f32 %v176_v15, %v174_v7  ;;  %v2933_v38 = vld [vmem:[#allocation7 + $0xe0] sm:$0xf]  ;;  %v2870_v40 = vor.u32 %v4113_v37, %v2869_v36 }
  0x2c   :  { %v3005_v26 = vld [vmem:[#allocation7 + $0x170] sm:$0xf]  ;;  %v2942_v28 = vor.u32 %v4131_v25, %v2941_v24  ;;  %v4147_v29 = vld [vmem:[#allocation7 + $0x174] sm:$0xf0]  ;;  %v4129_v41 = vld [vmem:[#allocation7 + $0xe4] sm:$0xf0]  ;;  %v711_v50 = vmul.f32 %v705_v20, %v705_v20 }
  0x2d   :  { %v3069_v30 = vld [vmem:[#allocation7 + $0x1f0] sm:$0xf]  ;;  %v4163_v31 = vld [vmem:[#allocation7 + $0x1f4] sm:$0xf0]  ;;  %v713_v33 = vadd.f32 %v712_v22, %v708_v17  ;;  %590 = vmatpush.bf16.msra.mxu0 %v2878_v23  ;;  %v3006_v34 = vor.u32 %v4147_v29, %v3005_v26  ;;  %v178_v39 = vadd.f32 %v177_v27, %v175_v14  ;;  %v2997_v42 = vld [vmem:[#allocation7 + $0x160] sm:$0xf]  ;;  %v2934_v45 = vor.u32 %v4129_v41, %v2933_v38 }
  0x2e   :  { %v3070_v35 = vor.u32 %v4163_v31, %v3069_v30  ;;  %603 = vmatpush.bf16.msra.mxu1 %v2942_v28  ;;  %v4145_v43 = vld [vmem:[#allocation7 + $0x164] sm:$0xf0]  ;;  %v3061_v47 = vld [vmem:[#allocation7 + $0x1e0] sm:$0xf]  ;;  %v2861_v49 = vld [vmem:[#allocation7 + $0x50] sm:$0xf] }
  0x2f   :  { %v714_v44 = vadd.f32 %v713_v33, %v709_v21  ;;  %616 = vmatpush.bf16.msra.mxu2 %v3006_v34  ;;  %v2998_v46 = vor.u32 %v4145_v43, %v2997_v42  ;;  %v4161_v48 = vld [vmem:[#allocation7 + $0x1e4] sm:$0xf0]  ;;  %179 = vadd.xlane.f32.xlu0 %v178_v39  ;;  %v4111_v52 = vld [vmem:[#allocation7 + $0x54] sm:$0xf0]  ;;  %v2925_v53 = vld [vmem:[#allocation7 + $0xd0] sm:$0xf] }
  0x30   :  { %629 = vmatpush.bf16.msra.mxu3 %v3070_v35  ;;  %v3062_v51 = vor.u32 %v4161_v48, %v3061_v47  ;;  %v4127_v54 = vld [vmem:[#allocation7 + $0xd4] sm:$0xf0]  ;;  %v2862_v56 = vor.u32 %v4111_v52, %v2861_v49  ;;  %v2989_v57 = vld [vmem:[#allocation7 + $0x150] sm:$0xf]  ;;  %v2853_v62 = vld [vmem:[#allocation7 + $0x40] sm:$0xf] }
  0x31   :  { %v715_v55 = vadd.f32 %v714_v44, %v710_v32  ;;  %591 = vmatpush.bf16.msra.mxu0 %v2870_v40  ;;  %v4143_v58 = vld [vmem:[#allocation7 + $0x154] sm:$0xf0]  ;;  %v3053_v59 = vld [vmem:[#allocation7 + $0x1d0] sm:$0xf]  ;;  %v2926_v60 = vor.u32 %v4127_v54, %v2925_v53  ;;  %v4109_v63 = vld [vmem:[#allocation7 + $0x44] sm:$0xf0] }
  0x32   :  { %604 = vmatpush.bf16.msra.mxu1 %v2934_v45  ;;  %v4159_v61 = vld [vmem:[#allocation7 + $0x1d4] sm:$0xf0]  ;;  %v2990_v0 = vor.u32 %v4143_v58, %v2989_v57  ;;  %v2917_v6 = vld [vmem:[#allocation7 + $0xc0] sm:$0xf]  ;;  %v4125_v7 = vld [vmem:[#allocation7 + $0xc4] sm:$0xf0]  ;;  %v2854_v17 = vor.u32 %v4109_v63, %v2853_v62 }
  0x33   :  { %617 = vmatpush.bf16.msra.mxu2 %v2998_v46  ;;  %v3054_v5 = vor.u32 %v4159_v61, %v3053_v59  ;;  %v2981_v12 = vld [vmem:[#allocation7 + $0x140] sm:$0xf]  ;;  %v716_v13 = vadd.f32 %v715_v55, %v711_v50  ;;  %v4141_v14 = vld [vmem:[#allocation7 + $0x144] sm:$0xf0]  ;;  %v2918_v18 = vor.u32 %v4125_v7, %v2917_v6  ;;  %v2845_v19 = vld [vmem:[#allocation7 + $0x30] sm:$0xf] }
  0x34   :  { %630 = vmatpush.bf16.msra.mxu3 %v3062_v51  ;;  %v3045_v15 = vld [vmem:[#allocation7 + $0x1c0] sm:$0xf]  ;;  %v4157_v16 = vld [vmem:[#allocation7 + $0x1c4] sm:$0xf0]  ;;  %v4107_v20 = vld [vmem:[#allocation7 + $0x34] sm:$0xf0]  ;;  %v2982_v21 = vor.u32 %v4141_v14, %v2981_v12 }
  0x35   :  { %592 = vmatpush.bf16.msra.mxu0 %v2862_v56  ;;  %v3046_v22 = vor.u32 %v4157_v16, %v3045_v15  ;;  %v2909_v23 = vld [vmem:[#allocation7 + $0xb0] sm:$0xf]  ;;  %v4123_v24 = vld [vmem:[#allocation7 + $0xb4] sm:$0xf0]  ;;  %v2846_v29 = vor.u32 %v4107_v20, %v2845_v19  ;;  %v2837_v31 = vld [vmem:[#allocation7 + $0x20] sm:$0xf] }
  0x36   :  { %605 = vmatpush.bf16.msra.mxu1 %v2926_v60  ;;  %v2973_v25 = vld [vmem:[#allocation7 + $0x130] sm:$0xf]  ;;  %v4139_v26 = vld [vmem:[#allocation7 + $0x134] sm:$0xf0]  ;;  %v2910_v30 = vor.u32 %v4123_v24, %v2909_v23  ;;  %v4105_v32 = vld [vmem:[#allocation7 + $0x24] sm:$0xf0] }
  0x37   :  { %618 = vmatpush.bf16.msra.mxu2 %v2990_v0  ;;  %717 = vadd.xlane.f32.xlu0 %v716_v13  ;;  %v3037_v27 = vld [vmem:[#allocation7 + $0x1b0] sm:$0xf]  ;;  %v4155_v28 = vld [vmem:[#allocation7 + $0x1b4] sm:$0xf0]  ;;  %v2974_v33 = vor.u32 %v4139_v26, %v2973_v25  ;;  %v2901_v35 = vld [vmem:[#allocation7 + $0xa0] sm:$0xf]  ;;  %v2838_v41 = vor.u32 %v4105_v32, %v2837_v31 }
  0x38   :  { %631 = vmatpush.bf16.msra.mxu3 %v3054_v5  ;;  %v3038_v34 = vor.u32 %v4155_v28, %v3037_v27  ;;  %v4121_v36 = vld [vmem:[#allocation7 + $0xa4] sm:$0xf0]  ;;  %v2965_v37 = vld [vmem:[#allocation7 + $0x120] sm:$0xf]  ;;  %v2829_v43 = vld [vmem:[#allocation7 + $0x10] sm:$0xf] }
  0x39   :  { %593 = vmatpush.bf16.msra.mxu0 %v2854_v17  ;;  %v4137_v38 = vld [vmem:[#allocation7 + $0x124] sm:$0xf0]  ;;  %v3029_v39 = vld [vmem:[#allocation7 + $0x1a0] sm:$0xf]  ;;  %v2902_v42 = vor.u32 %v4121_v36, %v2901_v35  ;;  %v4103_v44 = vld [vmem:[#allocation7 + $0x14] sm:$0xf0] }
  0x3a   :  { %606 = vmatpush.bf16.msra.mxu1 %v2918_v18  ;;  %v4153_v40 = vld [vmem:[#allocation7 + $0x1a4] sm:$0xf0]  ;;  %v2966_v45 = vor.u32 %v4137_v38, %v2965_v37  ;;  %v2893_v47 = vld [vmem:[#allocation7 + $0x90] sm:$0xf]  ;;  %v4119_v48 = vld [vmem:[#allocation7 + $0x94] sm:$0xf0]  ;;  %v2830_v53 = vor.u32 %v4103_v44, %v2829_v43 }
  0x3b   :  { %619 = vmatpush.bf16.msra.mxu2 %v2982_v21  ;;  %v3030_v46 = vor.u32 %v4153_v40, %v3029_v39  ;;  %v2957_v49 = vld [vmem:[#allocation7 + $0x110] sm:$0xf]  ;;  %v4135_v50 = vld [vmem:[#allocation7 + $0x114] sm:$0xf0]  ;;  %v2821_v54 = vld [vmem:[#allocation7] sm:$0xf]  ;;  %v2894_v57 = vor.u32 %v4119_v48, %v2893_v47 }
  0x3c   :  { %632 = vmatpush.bf16.msra.mxu3 %v3046_v22  ;;  %v3021_v51 = vld [vmem:[#allocation7 + $0x190] sm:$0xf]  ;;  %v4151_v52 = vld [vmem:[#allocation7 + $0x194] sm:$0xf0]  ;;  %v4101_v55 = vld [vmem:[#allocation7 + $0x4] sm:$0xf0]  ;;  %v2958_v61 = vor.u32 %v4135_v50, %v2957_v49 }
  0x3d   :  { %594 = vmatpush.bf16.msra.mxu0 %v2846_v29  ;;  %v2885_v56 = vld [vmem:[#allocation7 + $0x80] sm:$0xf]  ;;  %v4117_v58 = vld [vmem:[#allocation7 + $0x84] sm:$0xf0]  ;;  %v3022_v62 = vor.u32 %v4151_v52, %v3021_v51  ;;  %v4114_v0 = vld [vmem:[#allocation7 + $0x74] sm:$0xf]  ;;  %v2822_v13 = vor.u32 %v4101_v55, %v2821_v54 }
  0x3e   :  { %607 = vmatpush.bf16.msra.mxu1 %v2910_v30  ;;  %v2949_v59 = vld [vmem:[#allocation7 + $0x100] sm:$0xf]  ;;  %v4133_v60 = vld [vmem:[#allocation7 + $0x104] sm:$0xf0]  ;;  %v2879_v5 = vld [vmem:[#allocation7 + $0x78] sm:$0xf0]  ;;  %v2886_v16 = vor.u32 %v4117_v58, %v2885_v56 }
  0x3f   :  { %620 = vmatpush.bf16.msra.mxu2 %v2974_v33  ;;  %v3013_v63 = vld [vmem:[#allocation7 + $0x180] sm:$0xf]  ;;  %v4149_v6 = vld [vmem:[#allocation7 + $0x184] sm:$0xf0]  ;;  %v4130_v7 = vld [vmem:[#allocation7 + $0xf4] sm:$0xf]  ;;  %v2882_v17 = vor.u32 %v4114_v0, %v2879_v5  ;;  %v2950_v20 = vor.u32 %v4133_v60, %v2949_v59 }
  0x40   :  { %633 = vmatpush.bf16.msra.mxu3 %v3038_v34  ;;  %v2943_v12 = vld [vmem:[#allocation7 + $0xf8] sm:$0xf0]  ;;  %v4146_v14 = vld [vmem:[#allocation7 + $0x174] sm:$0xf]  ;;  %v3014_v21 = vor.u32 %v4149_v6, %v3013_v63  ;;  %v4112_v22 = vld [vmem:[#allocation7 + $0x64] sm:$0xf] }
  0x41   :  { %595 = vmatpush.bf16.msra.mxu0 %v2838_v41  ;;  %v3007_v15 = vld [vmem:[#allocation7 + $0x178] sm:$0xf0]  ;;  %v4162_v18 = vld [vmem:[#allocation7 + $0x1f4] sm:$0xf]  ;;  %v2871_v23 = vld [vmem:[#allocation7 + $0x68] sm:$0xf0]  ;;  %v2946_v24 = vor.u32 %v4130_v7, %v2943_v12 }
  0x42   :  { %608 = vmatpush.bf16.msra.mxu1 %v2902_v42  ;;  %v3071_v19 = vld [vmem:[#allocation7 + $0x1f8] sm:$0xf0]  ;;  %v3010_v25 = vor.u32 %v4146_v14, %v3007_v15  ;;  %v4128_v26 = vld [vmem:[#allocation7 + $0xe4] sm:$0xf]  ;;  %v2935_v28 = vld [vmem:[#allocation7 + $0xe8] sm:$0xf0]  ;;  %v2874_v31 = vor.u32 %v4112_v22, %v2871_v23 }
  0x43   :  { %621 = vmatpush.bf16.msra.mxu2 %v2966_v45  ;;  %v3074_v27 = vor.u32 %v4162_v18, %v3071_v19  ;;  %v4144_v29 = vld [vmem:[#allocation7 + $0x164] sm:$0xf]  ;;  %v2999_v30 = vld [vmem:[#allocation7 + $0x168] sm:$0xf0]  ;;  %v2938_v34 = vor.u32 %v4128_v26, %v2935_v28  ;;  %v4110_v37 = vld [vmem:[#allocation7 + $0x54] sm:$0xf] }
  0x44   :  { %634 = vmatpush.bf16.msra.mxu3 %v3030_v46  ;;  %v4160_v32 = vld [vmem:[#allocation7 + $0x1e4] sm:$0xf]  ;;  %v3063_v33 = vld [vmem:[#allocation7 + $0x1e8] sm:$0xf0]  ;;  %v3002_v35 = vor.u32 %v4144_v29, %v2999_v30  ;;  %v2863_v38 = vld [vmem:[#allocation7 + $0x58] sm:$0xf0] }
  0x45   :  { %596 = vmatpush.bf16.msra.mxu0 %v2830_v53  ;;  %v3066_v36 = vor.u32 %v4160_v32, %v3063_v33  ;;  %v4126_v39 = vld [vmem:[#allocation7 + $0xd4] sm:$0xf]  ;;  %v2866_v40 = vor.u32 %v4110_v37, %v2863_v38  ;;  %v2927_v41 = vld [vmem:[#allocation7 + $0xd8] sm:$0xf0]  ;;  %v4108_v49 = vld [vmem:[#allocation7 + $0x44] sm:$0xf] }
  0x46   :  { %609 = vmatpush.bf16.msra.mxu1 %v2894_v57  ;;  %v4142_v42 = vld [vmem:[#allocation7 + $0x154] sm:$0xf]  ;;  %v2991_v43 = vld [vmem:[#allocation7 + $0x158] sm:$0xf0]  ;;  %v2930_v44 = vor.u32 %v4126_v39, %v2927_v41  ;;  %v2855_v50 = vld [vmem:[#allocation7 + $0x48] sm:$0xf0] }
  0x47   :  { %622 = vmatpush.bf16.msra.mxu2 %v2958_v61  ;;  %v2994_v45 = vor.u32 %v4142_v42, %v2991_v43  ;;  %v4158_v46 = vld [vmem:[#allocation7 + $0x1d4] sm:$0xf]  ;;  %v3055_v47 = vld [vmem:[#allocation7 + $0x1d8] sm:$0xf0]  ;;  %v4124_v51 = vld [vmem:[#allocation7 + $0xc4] sm:$0xf]  ;;  %v2858_v52 = vor.u32 %v4108_v49, %v2855_v50 }
  0x48   :  { %635 = vmatpush.bf16.msra.mxu3 %v3022_v62  ;;  %v3058_v48 = vor.u32 %v4158_v46, %v3055_v47  ;;  %v2919_v53 = vld [vmem:[#allocation7 + $0xc8] sm:$0xf0]  ;;  %v4140_v54 = vld [vmem:[#allocation7 + $0x144] sm:$0xf]  ;;  %v4106_v61 = vld [vmem:[#allocation7 + $0x34] sm:$0xf] }
  0x49   :  { %597 = vmatpush.bf16.msra.mxu0 %v2822_v13  ;;  %v2983_v55 = vld [vmem:[#allocation7 + $0x148] sm:$0xf0]  ;;  %v2922_v56 = vor.u32 %v4124_v51, %v2919_v53  ;;  %v4156_v58 = vld [vmem:[#allocation7 + $0x1c4] sm:$0xf]  ;;  %v2847_v62 = vld [vmem:[#allocation7 + $0x38] sm:$0xf0] }
  0x4a   :  { %610 = vmatpush.bf16.msra.mxu1 %v2886_v16  ;;  %v2986_v57 = vor.u32 %v4140_v54, %v2983_v55  ;;  %v3047_v59 = vld [vmem:[#allocation7 + $0x1c8] sm:$0xf0]  ;;  %v4122_v63 = vld [vmem:[#allocation7 + $0xb4] sm:$0xf]  ;;  %v2850_v0 = vor.u32 %v4106_v61, %v2847_v62  ;;  %v2911_v5 = vld [vmem:[#allocation7 + $0xb8] sm:$0xf0] }
  0x4b   :  { %623 = vmatpush.bf16.msra.mxu2 %v2950_v20  ;;  %v3050_v60 = vor.u32 %v4156_v58, %v3047_v59  ;;  %v4138_v6 = vld [vmem:[#allocation7 + $0x134] sm:$0xf]  ;;  %v2975_v7 = vld [vmem:[#allocation7 + $0x138] sm:$0xf0]  ;;  %v2914_v12 = vor.u32 %v4122_v63, %v2911_v5  ;;  %v2839_v18 = vld [vmem:[#allocation7 + $0x28] sm:$0xf0] }
  0x4c   :  { %636 = vmatpush.bf16.msra.mxu3 %v3014_v21  ;;  %v2978_v13 = vor.u32 %v4138_v6, %v2975_v7  ;;  %v4154_v14 = vld [vmem:[#allocation7 + $0x1b4] sm:$0xf]  ;;  %v3039_v15 = vld [vmem:[#allocation7 + $0x1b8] sm:$0xf0]  ;;  %v4120_v19 = vld [vmem:[#allocation7 + $0xa4] sm:$0xf] }
  0x4d   :  { %642 = vmatpush.bf16.msrb.mxu0 %v2882_v17  ;;  %v3042_v16 = vor.u32 %v4154_v14, %v3039_v15  ;;  %v4104_v17 = vld [vmem:[#allocation7 + $0x24] sm:$0xf]  ;;  %v2903_v21 = vld [vmem:[#allocation7 + $0xa8] sm:$0xf0]  ;;  %v4102_v29 = vld [vmem:[#allocation7 + $0x14] sm:$0xf] }
  0x4e   :  { %655 = vmatpush.bf16.msrb.mxu1 %v2946_v24  ;;  %v2842_v20 = vor.u32 %v4104_v17, %v2839_v18  ;;  %v4136_v22 = vld [vmem:[#allocation7 + $0x124] sm:$0xf]  ;;  %v2967_v23 = vld [vmem:[#allocation7 + $0x128] sm:$0xf0]  ;;  %v2906_v24 = vor.u32 %v4120_v19, %v2903_v21  ;;  %v2831_v30 = vld [vmem:[#allocation7 + $0x18] sm:$0xf0] }
  0x4f   :  { %668 = vmatpush.bf16.msrb.mxu2 %v3010_v25  ;;  %v2970_v25 = vor.u32 %v4136_v22, %v2967_v23  ;;  %v4152_v26 = vld [vmem:[#allocation7 + $0x1a4] sm:$0xf]  ;;  %v2834_v32 = vor.u32 %v4102_v29, %v2831_v30  ;;  %v2895_v33 = vld [vmem:[#allocation7 + $0x98] sm:$0xf0]  ;;  %v4150_v38 = vld [vmem:[#allocation7 + $0x194] sm:$0xf] }
  0x50   :  { %681 = vmatpush.bf16.msrb.mxu3 %v3074_v27  ;;  %v3031_v27 = vld [vmem:[#allocation7 + $0x1a8] sm:$0xf0]  ;;  %v3023_v39 = vld [vmem:[#allocation7 + $0x198] sm:$0xf0]  ;;  %v4116_v43 = vld [vmem:[#allocation7 + $0x84] sm:$0xf] }
  0x51   :  { %643 = vmatpush.bf16.msrb.mxu0 %v2874_v31  ;;  %v3034_v28 = vor.u32 %v4152_v26, %v3031_v27  ;;  %v4118_v31 = vld [vmem:[#allocation7 + $0x94] sm:$0xf]  ;;  %v3026_v41 = vor.u32 %v4150_v38, %v3023_v39  ;;  %v2823_v42 = vld [vmem:[#allocation7 + $0x8] sm:$0xf0]  ;;  %v4132_v47 = vld [vmem:[#allocation7 + $0x104] sm:$0xf] }
  0x52   :  { %656 = vmatpush.bf16.msrb.mxu1 %v2938_v34  ;;  %v4134_v34 = vld [vmem:[#allocation7 + $0x114] sm:$0xf]  ;;  %v4148_v49 = vld [vmem:[#allocation7 + $0x184] sm:$0xf]  ;;  %v3015_v51 = vld [vmem:[#allocation7 + $0x188] sm:$0xf0] }
  0x53   :  { %669 = vmatpush.bf16.msrb.mxu2 %v3002_v35  ;;  %v2959_v35 = vld [vmem:[#allocation7 + $0x118] sm:$0xf0]  ;;  %v3133_v63 = vld [vmem:[#allocation8 + $0x70] sm:$0xf]  ;;  %v4195_v6 = vld [vmem:[#allocation8 + $0xf4] sm:$0xf0] }
  0x54   :  { %682 = vmatpush.bf16.msrb.mxu3 %v3066_v36  ;;  %v2898_v36 = vor.u32 %v4118_v31, %v2895_v33  ;;  %v2962_v37 = vor.u32 %v4134_v34, %v2959_v35  ;;  %v3197_v5 = vld [vmem:[#allocation8 + $0xf0] sm:$0xf]  ;;  %v4211_v17 = vld [vmem:[#allocation8 + $0x174] sm:$0xf0]  ;;  %v4177_v26 = vld [vmem:[#allocation8 + $0x64] sm:$0xf0] }
  0x55   :  { %644 = vmatpush.bf16.msrb.mxu0 %v2866_v40  ;;  %v4100_v40 = vld [vmem:[#allocation7 + $0x4] sm:$0xf]  ;;  %v3325_v18 = vld [vmem:[#allocation8 + $0x1f0] sm:$0xf]  ;;  %v4227_v19 = vld [vmem:[#allocation8 + $0x1f4] sm:$0xf0]  ;;  %v3198_v21 = vor.u32 %v4195_v6, %v3197_v5 }
  0x56   :  { %657 = vmatpush.bf16.msrb.mxu1 %v2930_v44  ;;  %v2887_v44 = vld [vmem:[#allocation7 + $0x88] sm:$0xf0]  ;;  %v3326_v27 = vor.u32 %v4227_v19, %v3325_v18  ;;  %v4209_v30 = vld [vmem:[#allocation8 + $0x164] sm:$0xf0]  ;;  %v3317_v31 = vld [vmem:[#allocation8 + $0x1e0] sm:$0xf] }
  0x57   :  { %670 = vmatpush.bf16.msrb.mxu2 %v2994_v45  ;;  %v2826_v45 = vor.u32 %v4100_v40, %v2823_v42  ;;  %v2890_v46 = vor.u32 %v4116_v43, %v2887_v44  ;;  %v3117_v35 = vld [vmem:[#allocation8 + $0x50] sm:$0xf]  ;;  %v4191_v40 = vld [vmem:[#allocation8 + $0xd4] sm:$0xf0]  ;;  %v3093_v19 = vld [vmem:[#allocation8 + $0x20] sm:$0xf] }
  0x58   :  { %683 = vmatpush.bf16.msrb.mxu3 %v3058_v48  ;;  %v2951_v48 = vld [vmem:[#allocation7 + $0x108] sm:$0xf0]  ;;  %v3181_v39 = vld [vmem:[#allocation8 + $0xd0] sm:$0xf]  ;;  %v4207_v43 = vld [vmem:[#allocation8 + $0x154] sm:$0xf0] }
  0x59   :  { %645 = vmatpush.bf16.msrb.mxu0 %v2858_v52  ;;  %v2954_v50 = vor.u32 %v4132_v47, %v2951_v48  ;;  %v3018_v52 = vor.u32 %v4148_v49, %v3015_v51  ;;  %v3309_v44 = vld [vmem:[#allocation8 + $0x1d0] sm:$0xf]  ;;  %v3182_v47 = vor.u32 %v4191_v40, %v3181_v39  ;;  %v3109_v48 = vld [vmem:[#allocation8 + $0x40] sm:$0xf]  ;;  %v4173_v49 = vld [vmem:[#allocation8 + $0x44] sm:$0xf0] }
  0x5a   :  { %658 = vmatpush.bf16.msrb.mxu1 %v2922_v56  ;;  %v4199_v39 = vld [vmem:[#allocation8 + $0x114] sm:$0xf0]  ;;  %v3077_v40 = vld [vmem:[#allocation8] sm:$0xf] }
  0x5b   :  { %671 = vmatpush.bf16.msrb.mxu2 %v2986_v57 }
  0x5c   :  { %684 = vmatpush.bf16.msrb.mxu3 %v3050_v60 }
  0x5d   :  { %646 = vmatpush.bf16.msrb.mxu0 %v2850_v0  ;;  %v4179_v0 = vld [vmem:[#allocation8 + $0x74] sm:$0xf0] }
  0x5e   :  { %659 = vmatpush.bf16.msrb.mxu1 %v2914_v12  ;;  %v3261_v12 = vld [vmem:[#allocation8 + $0x170] sm:$0xf] }
  0x5f   :  { %672 = vmatpush.bf16.msrb.mxu2 %v2978_v13 }
  0x60   :  { %685 = vmatpush.bf16.msrb.mxu3 %v3042_v16 }
  0x61   :  { %647 = vmatpush.bf16.msrb.mxu0 %v2842_v20  ;;  %v3134_v20 = vor.u32 %v4179_v0, %v3133_v63  ;;  %v4171_v63 = vld [vmem:[#allocation8 + $0x34] sm:$0xf0]  ;;  %v3165_v0 = vld [vmem:[#allocation8 + $0xb0] sm:$0xf] }
  0x62   :  { %660 = vmatpush.bf16.msrb.mxu1 %v2906_v24 }
  0x63   :  { %673 = vmatpush.bf16.msrb.mxu2 %v2970_v25 }
  0x64   :  { %686 = vmatpush.bf16.msrb.mxu3 %v3034_v28  ;;  %v4193_v28 = vld [vmem:[#allocation8 + $0xe4] sm:$0xf0] }
  0x65   :  { %648 = vmatpush.bf16.msrb.mxu0 %v2834_v32  ;;  %v4225_v32 = vld [vmem:[#allocation8 + $0x1e4] sm:$0xf0] }
  0x66   :  { %661 = vmatpush.bf16.msrb.mxu1 %v2898_v36  ;;  %v4175_v36 = vld [vmem:[#allocation8 + $0x54] sm:$0xf0]  ;;  %v3318_v38 = vor.u32 %v4225_v32, %v3317_v31 }
  0x67   :  { %674 = vmatpush.bf16.msrb.mxu2 %v2962_v37 }
  0x68   :  { %687 = vmatpush.bf16.msrb.mxu3 %v3026_v41  ;;  %v3245_v41 = vld [vmem:[#allocation8 + $0x150] sm:$0xf] }
  0x69   :  { %649 = vmatpush.bf16.msrb.mxu0 %v2826_v45  ;;  %v4223_v45 = vld [vmem:[#allocation8 + $0x1d4] sm:$0xf0] }
  0x6a   :  { %662 = vmatpush.bf16.msrb.mxu1 %v2890_v46  ;;  %v3118_v46 = vor.u32 %v4175_v36, %v3117_v35  ;;  %v3310_v51 = vor.u32 %v4223_v45, %v3309_v44  ;;  %v3141_v44 = vld [vmem:[#allocation8 + $0x80] sm:$0xf]  ;;  %v4181_v45 = vld [vmem:[#allocation8 + $0x84] sm:$0xf0] }
  0x6b   :  { %675 = vmatpush.bf16.msrb.mxu2 %v2954_v50  ;;  %v3246_v50 = vor.u32 %v4207_v43, %v3245_v41  ;;  %v4165_v43 = vld [vmem:[#allocation8 + $0x4] sm:$0xf0] }
  0x6c   :  { %688 = vmatpush.bf16.msrb.mxu3 %v3018_v52 }
  0xa2   :  { %v180_v53 = vpop.xlane.xlu0 %179 }
  0xa3   :  { %v181_v54 = vmax.f32 %v180_v53, 1e-24  ;;  %v3173_v53 = vld [vmem:[#allocation8 + $0xc0] sm:$0xf] }
  0xa5   :  { %4433 = vrsqrt.f32 %v181_v54  ;;  %vm188_vm1 = vweird.f32 %v181_v54 }
  0xaa   :  { %v718_v58 = vpop.xlane.xlu0 %717 }
  0xab   :  { %v4434_v55 = vpop.eup %4433  ;;  %v4809_v60 = vmax.f32 %v718_v58, 1e-24  ;;  %v4221_v58 = vld [vmem:[#allocation8 + $0x1c4] sm:$0xf0] }
  0xac   :  { %v183_v56 = vmul.f32 %v4434_v55, %v181_v54  ;;  %vm189_vm0 = vweird.f32 %v4434_v55  ;;  %v4189_v54 = vld [vmem:[#allocation8 + $0xc4] sm:$0xf0] }
  0xad   :  { %vm190_vm2 = vmor %vm188_vm1, %vm189_vm0  ;;  %4435 = vrsqrt.f32 %v4809_v60  ;;  %vm726_vm3 = vweird.f32 %v4809_v60 }
  0xae   :  { %v184_v57 = vmul.f32 %v4434_v55, %v183_v56  ;;  %v4205_v56 = vld [vmem:[#allocation8 + $0x144] sm:$0xf0] }
  0xb0   :  { %v185_v59 = vmul.f32 0.5, %v184_v57  ;;  %v3301_v57 = vld [vmem:[#allocation8 + $0x1c0] sm:$0xf] }
  0xb2   :  { %v186_v61 = vsub.f32 1.5, %v185_v59  ;;  %v3110_v59 = vor.u32 %v4173_v49, %v3109_v48  ;;  %v3205_v49 = vld [vmem:[#allocation8 + $0x100] sm:$0xf] }
  0xb3   :  { %v4824_v29 = vpop.eup %4435 }
  0xb4   :  { %v187_v62 = vmul.f32 %v4434_v55, %v186_v61  ;;  %v721_v42 = vmul.f32 %v4824_v29, %v4809_v60  ;;  %v3174_v61 = vor.u32 %v4189_v54, %v3173_v53  ;;  %vm727_vm4 = vweird.f32 %v4824_v29  ;;  %v4197_v60 = vld [vmem:[#allocation8 + $0x104] sm:$0xf0]  ;;  %v4243_v53 = vld [vmem:[#allocation8 + $0x274] sm:$0xf0] }
  0xb5   :  { %vm728_vm5 = vmor %vm726_vm3, %vm727_vm4  ;;  %v3078_v54 = vor.u32 %v4165_v43, %v3077_v40  ;;  %v4253_v40 = vld [vmem:[#allocation8 + $0x2c4] sm:$0xf0]  ;;  %v4188_v43 = vld [vmem:[#allocation8 + $0xc4] sm:$0xf] }
  0xb6   :  { %v191_v7 = vsel %vm190_vm2, %v4434_v55, %v187_v62  ;;  %v722_v52 = vmul.f32 %v4824_v29, %v721_v42  ;;  %v3237_v55 = vld [vmem:[#allocation8 + $0x140] sm:$0xf]  ;;  %v3101_v62 = vld [vmem:[#allocation8 + $0x30] sm:$0xf]  ;;  %vm2808_vm2 = vcmask 7168  }
  0xb7   :  { %v192_v13 = vmul.f32 %v191_v7, %v4777_v1  ;;  %v193_v14 = vmul.f32 %v191_v7, %v4779_v2  ;;  %v194_v15 = vmul.f32 %v191_v7, %v4781_v3  ;;  %v195_v16 = vmul.f32 %v191_v7, %v4783_v4  ;;  %v3125_v1 = vld [vmem:[#allocation8 + $0x60] sm:$0xf] }
  0xb8   :  { %v3262_v2 = vor.u32 %v4211_v17, %v3261_v12  ;;  %v3189_v3 = vld [vmem:[#allocation8 + $0xe0] sm:$0xf]  ;;  %v3126_v33 = vor.u32 %v4177_v26, %v3125_v1  ;;  %v723_v5 = vmul.f32 0.5, %v722_v52  ;;  %v3238_v6 = vor.u32 %v4205_v56, %v3237_v55  ;;  %v4187_v12 = vld [vmem:[#allocation8 + $0xb4] sm:$0xf0] }
  0xb9   :  { %v4816_v22 = vpack.c.bf16 %v192_v13, %v192_v13  ;;  %v4818_v23 = vpack.c.bf16 %v193_v14, %v193_v14  ;;  %v4820_v24 = vpack.c.bf16 %v194_v15, %v194_v15  ;;  %v4822_v25 = vpack.c.bf16 %v195_v16, %v195_v16  ;;  %v3253_v4 = vld [vmem:[#allocation8 + $0x160] sm:$0xf]  ;;  %v3229_v13 = vld [vmem:[#allocation8 + $0x130] sm:$0xf]  ;;  %v4203_v14 = vld [vmem:[#allocation8 + $0x134] sm:$0xf0] }
  0xba   :  { %v3190_v34 = vor.u32 %v4193_v28, %v3189_v3  ;;  %v3254_v37 = vor.u32 %v4209_v30, %v3253_v4  ;;  %v3302_v7 = vor.u32 %v4221_v58, %v3301_v57  ;;  %v3293_v15 = vld [vmem:[#allocation8 + $0x1b0] sm:$0xf]  ;;  %v4219_v16 = vld [vmem:[#allocation8 + $0x1b4] sm:$0xf0]  ;;  %v3102_v17 = vor.u32 %v4171_v63, %v3101_v62  ;;  %v3221_v3 = vld [vmem:[#allocation8 + $0x120] sm:$0xf] }
  0xbb   :  { %598 = vmatmul.bf16.vlgmr.msra.gmra.mxu0 %v4816_v22  ;;  %611 = vmatmul.bf16.vlgmr.msra.gmra.mxu1 %v4818_v23  ;;  %v3166_v18 = vor.u32 %v4187_v12, %v3165_v0  ;;  %v724_v1 = vsub.f32 1.5, %v723_v5  ;;  %v3230_v26 = vor.u32 %v4203_v14, %v3229_v13  ;;  %v4201_v28 = vld [vmem:[#allocation8 + $0x124] sm:$0xf0]  ;;  %v3285_v4 = vld [vmem:[#allocation8 + $0x1a0] sm:$0xf]  ;;  %v3142_v55 = vor.u32 %v4181_v45, %v3141_v44 }
  0xbc   :  { %624 = vmatmul.bf16.vlgmr.msra.gmra.mxu2 %v4820_v24  ;;  %637 = vmatmul.bf16.vlgmr.msra.gmra.mxu3 %v4822_v25  ;;  %v4217_v30 = vld [vmem:[#allocation8 + $0x1a4] sm:$0xf0]  ;;  %v3222_v35 = vor.u32 %v4201_v28, %v3221_v3  ;;  %v3389_v52 = vld [vmem:[#allocation8 + $0x270] sm:$0xf]  ;;  %v4259_v57 = vld [vmem:[#allocation8 + $0x2f4] sm:$0xf0] }
  0xbd   :  { %1324 = vmatpush.bf16.msra.mxu0 %v3134_v20  ;;  %1337 = vmatpush.bf16.msra.mxu1 %v3198_v21  ;;  %v4169_v20 = vld [vmem:[#allocation8 + $0x24] sm:$0xf0]  ;;  %v3157_v21 = vld [vmem:[#allocation8 + $0xa0] sm:$0xf]  ;;  %v3286_v36 = vor.u32 %v4217_v30, %v3285_v4  ;;  %v3453_v56 = vld [vmem:[#allocation8 + $0x2f0] sm:$0xf]  ;;  %v3390_v12 = vor.u32 %v4243_v53, %v3389_v52 }
  0xbe   :  { %1350 = vmatpush.bf16.msra.mxu2 %v3262_v2  ;;  %1363 = vmatpush.bf16.msra.mxu3 %v3326_v27  ;;  %v3294_v2 = vor.u32 %v4219_v16, %v3293_v15  ;;  %v4185_v27 = vld [vmem:[#allocation8 + $0xa4] sm:$0xf0]  ;;  %v3094_v31 = vor.u32 %v4169_v20, %v3093_v19  ;;  %v4178_v58 = vld [vmem:[#allocation8 + $0x74] sm:$0xf]  ;;  %v3199_v62 = vld [vmem:[#allocation8 + $0xf8] sm:$0xf0]  ;;  %v3454_v13 = vor.u32 %v4259_v57, %v3453_v56 }
  0xbf   :  { %v3158_v32 = vor.u32 %v4185_v27, %v3157_v21  ;;  %v3381_v14 = vld [vmem:[#allocation8 + $0x260] sm:$0xf]  ;;  %v4241_v15 = vld [vmem:[#allocation8 + $0x264] sm:$0xf0]  ;;  %v4176_v19 = vld [vmem:[#allocation8 + $0x64] sm:$0xf] }
  0xc0   :  { %v4192_v20 = vld [vmem:[#allocation8 + $0xe4] sm:$0xf]  ;;  %v3191_v21 = vld [vmem:[#allocation8 + $0xe8] sm:$0xf0]  ;;  %v3373_v3 = vld [vmem:[#allocation8 + $0x250] sm:$0xf] }
  0xc1   :  { %1325 = vmatpush.bf16.msra.mxu0 %v3126_v33  ;;  %1338 = vmatpush.bf16.msra.mxu1 %v3190_v34  ;;  %v3085_v33 = vld [vmem:[#allocation8 + $0x10] sm:$0xf]  ;;  %v4167_v34 = vld [vmem:[#allocation8 + $0x14] sm:$0xf0]  ;;  %v3194_v30 = vor.u32 %v4192_v20, %v3191_v21  ;;  %v3175_v44 = vld [vmem:[#allocation8 + $0xc8] sm:$0xf0] }
  0xc2   :  { %1351 = vmatpush.bf16.msra.mxu2 %v3254_v37  ;;  %1364 = vmatpush.bf16.msra.mxu3 %v3318_v38  ;;  %v4183_v37 = vld [vmem:[#allocation8 + $0x94] sm:$0xf0]  ;;  %v3213_v38 = vld [vmem:[#allocation8 + $0x110] sm:$0xf]  ;;  %v3086_v41 = vor.u32 %v4167_v34, %v3085_v33  ;;  %v4174_v33 = vld [vmem:[#allocation8 + $0x54] sm:$0xf] }
  0xc3   :  { %v4239_v28 = vld [vmem:[#allocation8 + $0x254] sm:$0xf0]  ;;  %v3119_v34 = vld [vmem:[#allocation8 + $0x58] sm:$0xf0]  ;;  %v4170_v53 = vld [vmem:[#allocation8 + $0x34] sm:$0xf] }
  0xc4   :  { %v4251_v52 = vld [vmem:[#allocation8 + $0x2b4] sm:$0xf0]  ;;  %v3167_v56 = vld [vmem:[#allocation8 + $0xb8] sm:$0xf0]  ;;  %v4182_v21 = vld [vmem:[#allocation8 + $0x94] sm:$0xf] }
  0xc5   :  { %1326 = vmatpush.bf16.msra.mxu0 %v3118_v46  ;;  %1339 = vmatpush.bf16.msra.mxu1 %v3182_v47  ;;  %v3214_v47 = vor.u32 %v4199_v39, %v3213_v38  ;;  %v4237_v38 = vld [vmem:[#allocation8 + $0x244] sm:$0xf0]  ;;  %v3122_v39 = vor.u32 %v4174_v33, %v3119_v34  ;;  %v3087_v20 = vld [vmem:[#allocation8 + $0x18] sm:$0xf0]  ;;  %v4164_v34 = vld [vmem:[#allocation8 + $0x4] sm:$0xf] }
  0xc6   :  { %1352 = vmatpush.bf16.msra.mxu2 %v3246_v50  ;;  %1365 = vmatpush.bf16.msra.mxu3 %v3310_v51  ;;  %v3269_v50 = vld [vmem:[#allocation8 + $0x180] sm:$0xf]  ;;  %v4213_v51 = vld [vmem:[#allocation8 + $0x184] sm:$0xf0] }
  0xc7   :  { %v3270_v5 = vor.u32 %v4213_v51, %v3269_v50  ;;  %v3178_v50 = vor.u32 %v4188_v43, %v3175_v44  ;;  %v3421_v51 = vld [vmem:[#allocation8 + $0x2b0] sm:$0xf]  ;;  %v3455_v43 = vld [vmem:[#allocation8 + $0x2f8] sm:$0xf0] }
  0xc9   :  { %1327 = vmatpush.bf16.msra.mxu0 %v3110_v59  ;;  %1340 = vmatpush.bf16.msra.mxu1 %v3174_v61  ;;  %v3206_v59 = vor.u32 %v4197_v60, %v3205_v49  ;;  %v4194_v61 = vld [vmem:[#allocation8 + $0xf4] sm:$0xf]  ;;  %v4235_v49 = vld [vmem:[#allocation8 + $0x234] sm:$0xf0] }
  0xca   :  { %1353 = vmatpush.bf16.msra.mxu2 %v3238_v6  ;;  %1366 = vmatpush.bf16.msra.mxu3 %v3302_v7 }
  0xcb   :  { %650 = vmatmul.bf16.vlgmr.msrb.gmra.mxu0 %v4816_v22  ;;  %663 = vmatmul.bf16.vlgmr.msrb.gmra.mxu1 %v4818_v23  ;;  %v3149_v22 = vld [vmem:[#allocation8 + $0x90] sm:$0xf]  ;;  %v725_v23 = vmul.f32 %v4824_v29, %v724_v1 }
  0xcc   :  { %676 = vmatmul.bf16.vlgmr.msrb.gmra.mxu2 %v4820_v24  ;;  %689 = vmatmul.bf16.vlgmr.msrb.gmra.mxu3 %v4822_v25  ;;  %v3277_v24 = vld [vmem:[#allocation8 + $0x190] sm:$0xf]  ;;  %v4215_v25 = vld [vmem:[#allocation8 + $0x194] sm:$0xf0]  ;;  %v3150_v42 = vor.u32 %v4183_v37, %v3149_v22  ;;  %v4190_v22 = vld [vmem:[#allocation8 + $0xd4] sm:$0xf] }
  0xcd   :  { %1328 = vmatpush.bf16.msra.mxu0 %v3102_v17  ;;  %1341 = vmatpush.bf16.msra.mxu1 %v3166_v18  ;;  %v4845_v46 = vsel %vm728_vm5, %v4824_v29, %v725_v23  ;;  %v3278_v48 = vor.u32 %v4215_v25, %v3277_v24  ;;  %v3135_v29 = vld [vmem:[#allocation8 + $0x78] sm:$0xf0]  ;;  %v3202_v17 = vor.u32 %v4194_v61, %v3199_v62  ;;  %v3445_v18 = vld [vmem:[#allocation8 + $0x2e0] sm:$0xf] }
  0xce   :  { %1354 = vmatpush.bf16.msra.mxu2 %v3230_v26  ;;  %1367 = vmatpush.bf16.msra.mxu3 %v3294_v2  ;;  %v730_v63 = vmul.f32 %v4845_v46, %v4791_v8  ;;  %v731_v0 = vmul.f32 %v4845_v46, %v4793_v9  ;;  %v732_v6 = vmul.f32 %v4845_v46, %v4795_v10  ;;  %v4257_v8 = vld [vmem:[#allocation8 + $0x2e4] sm:$0xf0]  ;;  %v3127_v9 = vld [vmem:[#allocation8 + $0x68] sm:$0xf0]  ;;  %v3183_v23 = vld [vmem:[#allocation8 + $0xd8] sm:$0xf0] }
  0xcf   :  { %v733_v7 = vmul.f32 %v4845_v46, %v4797_v11  ;;  %v3138_v16 = vor.u32 %v4178_v58, %v3135_v29  ;;  %v3382_v2 = vor.u32 %v4241_v15, %v3381_v14  ;;  %v3446_v27 = vor.u32 %v4257_v8, %v3445_v18  ;;  %v3365_v37 = vld [vmem:[#allocation8 + $0x240] sm:$0xf]  ;;  %v4233_v29 = vld [vmem:[#allocation8 + $0x224] sm:$0xf0]  ;;  %v3341_v15 = vld [vmem:[#allocation8 + $0x210] sm:$0xf] }
  0xd0   :  { %v4855_v1 = vpack.c.bf16 %v730_v63, %v730_v63  ;;  %v4857_v10 = vpack.c.bf16 %v731_v0, %v731_v0  ;;  %v4859_v11 = vpack.c.bf16 %v732_v6, %v732_v6  ;;  %v3130_v4 = vor.u32 %v4176_v19, %v3127_v9  ;;  %v3429_v25 = vld [vmem:[#allocation8 + $0x2c0] sm:$0xf]  ;;  %v4249_v0 = vld [vmem:[#allocation8 + $0x2a4] sm:$0xf0]  ;;  %v3095_v6 = vld [vmem:[#allocation8 + $0x28] sm:$0xf0] }
  0xd1   :  { %1329 = vmatpush.bf16.msra.mxu0 %v3094_v31  ;;  %1342 = vmatpush.bf16.msra.mxu1 %v3158_v32  ;;  %v4861_v26 = vpack.c.bf16 %v733_v7, %v733_v7  ;;  %v3437_v31 = vld [vmem:[#allocation8 + $0x2d0] sm:$0xf]  ;;  %v4255_v32 = vld [vmem:[#allocation8 + $0x2d4] sm:$0xf0]  ;;  %v3186_v24 = vor.u32 %v4190_v22, %v3183_v23  ;;  %v3366_v45 = vor.u32 %v4237_v38, %v3365_v37  ;;  %v3413_v63 = vld [vmem:[#allocation8 + $0x2a0] sm:$0xf] }
  0xd2   :  { %1355 = vmatpush.bf16.msra.mxu2 %v3222_v35  ;;  %1368 = vmatpush.bf16.msra.mxu3 %v3286_v36  ;;  %v3374_v35 = vor.u32 %v4239_v28, %v3373_v3  ;;  %v3438_v36 = vor.u32 %v4255_v32, %v3437_v31  ;;  %v3422_v58 = vor.u32 %v4251_v52, %v3421_v51  ;;  %v4184_v7 = vld [vmem:[#allocation8 + $0xa4] sm:$0xf]  ;;  %v3405_v8 = vld [vmem:[#allocation8 + $0x290] sm:$0xf]  ;;  %v4247_v19 = vld [vmem:[#allocation8 + $0x294] sm:$0xf0] }
  0xd3   :  { %v3414_v14 = vor.u32 %v4249_v0, %v3413_v63  ;;  %v4166_v9 = vld [vmem:[#allocation8 + $0x14] sm:$0xf]  ;;  %v3406_v28 = vor.u32 %v4247_v19, %v3405_v8  ;;  %v4245_v31 = vld [vmem:[#allocation8 + $0x284] sm:$0xf0]  ;;  %v3079_v22 = vld [vmem:[#allocation8 + $0x8] sm:$0xf0] }
  0xd4   :  { %v3090_v32 = vor.u32 %v4166_v9, %v3087_v20  ;;  %v4180_v23 = vld [vmem:[#allocation8 + $0x84] sm:$0xf]  ;;  %v3263_v37 = vld [vmem:[#allocation8 + $0x178] sm:$0xf0]  ;;  %v4226_v38 = vld [vmem:[#allocation8 + $0x1f4] sm:$0xf]  ;;  %v3082_v44 = vor.u32 %v4164_v34, %v3079_v22 }
  0xd5   :  { %1330 = vmatpush.bf16.msra.mxu0 %v3086_v41  ;;  %1343 = vmatpush.bf16.msra.mxu1 %v3150_v42  ;;  %v4172_v41 = vld [vmem:[#allocation8 + $0x44] sm:$0xf]  ;;  %v3111_v42 = vld [vmem:[#allocation8 + $0x48] sm:$0xf0] }
  0xd6   :  { %1356 = vmatpush.bf16.msra.mxu2 %v3214_v47  ;;  %1369 = vmatpush.bf16.msra.mxu3 %v3278_v48  ;;  %v3430_v47 = vor.u32 %v4253_v40, %v3429_v25  ;;  %v3357_v48 = vld [vmem:[#allocation8 + $0x230] sm:$0xf]  ;;  %v3114_v60 = vor.u32 %v4172_v41, %v3111_v42  ;;  %v3391_v41 = vld [vmem:[#allocation8 + $0x278] sm:$0xf0]  ;;  %v4258_v42 = vld [vmem:[#allocation8 + $0x2f4] sm:$0xf] }
  0xd7   :  { %v3358_v57 = vor.u32 %v4235_v49, %v3357_v48  ;;  %v4208_v52 = vld [vmem:[#allocation8 + $0x164] sm:$0xf]  ;;  %v3239_v20 = vld [vmem:[#allocation8 + $0x148] sm:$0xf0] }
  0xd8   :  { %v4204_v9 = vld [vmem:[#allocation8 + $0x144] sm:$0xf] }
  0xd9   :  { %1331 = vmatpush.bf16.msra.mxu0 %v3078_v54  ;;  %1344 = vmatpush.bf16.msra.mxu1 %v3142_v55  ;;  %v3103_v54 = vld [vmem:[#allocation8 + $0x38] sm:$0xf0]  ;;  %v4186_v55 = vld [vmem:[#allocation8 + $0xb4] sm:$0xf] }
  0xda   :  { %1357 = vmatpush.bf16.msra.mxu2 %v3206_v59  ;;  %1370 = vmatpush.bf16.msra.mxu3 %v3270_v5  ;;  %v3349_v59 = vld [vmem:[#allocation8 + $0x220] sm:$0xf]  ;;  %v3106_v61 = vor.u32 %v4170_v53, %v3103_v54  ;;  %v3170_v62 = vor.u32 %v4186_v55, %v3167_v56  ;;  %v4168_v5 = vld [vmem:[#allocation8 + $0x24] sm:$0xf]  ;;  %v3255_v53 = vld [vmem:[#allocation8 + $0x168] sm:$0xf0]  ;;  %v3458_v55 = vor.u32 %v4258_v42, %v3455_v43 }
  0xdb   :  { %v4224_v56 = vld [vmem:[#allocation8 + $0x1e4] sm:$0xf] }
  0xdc   :  { %1332 = vmatmul.bf16.vlgmr.msra.gmra.mxu0 %v4855_v1  ;;  %1345 = vmatmul.bf16.vlgmr.msra.gmra.mxu1 %v4857_v10 }
  0xdd   :  { %1376 = vmatpush.bf16.msrb.mxu0 %v3390_v12  ;;  %1389 = vmatpush.bf16.msrb.mxu1 %v3454_v13  ;;  %v3159_v12 = vld [vmem:[#allocation8 + $0xa8] sm:$0xf0]  ;;  %v3350_v13 = vor.u32 %v4233_v29, %v3349_v59  ;;  %v4256_v29 = vld [vmem:[#allocation8 + $0x2e4] sm:$0xf] }
  0xde   :  { %1402 = vmatpush.bf16.msrb.mxu2 %v3138_v16  ;;  %1415 = vmatpush.bf16.msrb.mxu3 %v3202_v17  ;;  %v4231_v16 = vld [vmem:[#allocation8 + $0x214] sm:$0xf0]  ;;  %v3098_v17 = vor.u32 %v4168_v5, %v3095_v6  ;;  %v3162_v18 = vor.u32 %v4184_v7, %v3159_v12  ;;  %v3383_v59 = vld [vmem:[#allocation8 + $0x268] sm:$0xf0]  ;;  %v4206_v5 = vld [vmem:[#allocation8 + $0x154] sm:$0xf] }
  0xdf   :  { %1358 = vmatmul.bf16.vlgmr.msra.gmra.mxu2 %v4859_v11  ;;  %1371 = vmatmul.bf16.vlgmr.msra.gmra.mxu3 %v4861_v26  ;;  %v3342_v3 = vor.u32 %v4231_v16, %v3341_v15  ;;  %v3247_v6 = vld [vmem:[#allocation8 + $0x158] sm:$0xf0]  ;;  %v4238_v15 = vld [vmem:[#allocation8 + $0x254] sm:$0xf] }
  0xe0   :  { %v3375_v16 = vld [vmem:[#allocation8 + $0x258] sm:$0xf0]  ;;  %v3250_v8 = vor.u32 %v4206_v5, %v3247_v6  ;;  %v4196_v5 = vld [vmem:[#allocation8 + $0x104] sm:$0xf]  ;;  %v3207_v6 = vld [vmem:[#allocation8 + $0x108] sm:$0xf0] }
  0xe1   :  { %1377 = vmatpush.bf16.msrb.mxu0 %v3382_v2  ;;  %1390 = vmatpush.bf16.msrb.mxu1 %v3446_v27  ;;  %v3151_v2 = vld [vmem:[#allocation8 + $0x98] sm:$0xf0]  ;;  %v3333_v27 = vld [vmem:[#allocation8 + $0x200] sm:$0xf] }
  0xe2   :  { %1403 = vmatpush.bf16.msrb.mxu2 %v3130_v4  ;;  %1416 = vmatpush.bf16.msrb.mxu3 %v3194_v30  ;;  %v4229_v4 = vld [vmem:[#allocation8 + $0x204] sm:$0xf0]  ;;  %v3397_v30 = vld [vmem:[#allocation8 + $0x280] sm:$0xf]  ;;  %v3154_v33 = vor.u32 %v4182_v21, %v3151_v2  ;;  %v3378_v21 = vor.u32 %v4238_v15, %v3375_v16  ;;  %v4228_v15 = vld [vmem:[#allocation8 + $0x204] sm:$0xf] }
  0xe3   :  { %v3334_v25 = vor.u32 %v4229_v4, %v3333_v27  ;;  %v3398_v40 = vor.u32 %v4245_v31, %v3397_v30  ;;  %v4220_v27 = vld [vmem:[#allocation8 + $0x1c4] sm:$0xf]  ;;  %v3367_v4 = vld [vmem:[#allocation8 + $0x248] sm:$0xf0] }
  0xe4   :  { %v4252_v30 = vld [vmem:[#allocation8 + $0x2c4] sm:$0xf]  ;;  %v3431_v31 = vld [vmem:[#allocation8 + $0x2c8] sm:$0xf0] }
  0xe5   :  { %1378 = vmatpush.bf16.msrb.mxu0 %v3374_v35  ;;  %1391 = vmatpush.bf16.msrb.mxu1 %v3438_v36  ;;  %v3143_v35 = vld [vmem:[#allocation8 + $0x88] sm:$0xf0]  ;;  %v4210_v36 = vld [vmem:[#allocation8 + $0x174] sm:$0xf]  ;;  %v3434_v22 = vor.u32 %v4252_v30, %v3431_v31  ;;  %v4275_v30 = vld [vmem:[#allocation11 + $0x74] sm:$0xf0] }
  0xe6   :  { %1404 = vmatpush.bf16.msrb.mxu2 %v3122_v39  ;;  %1417 = vmatpush.bf16.msrb.mxu3 %v3186_v24  ;;  %v3327_v39 = vld [vmem:[#allocation8 + $0x1f8] sm:$0xf0]  ;;  %v4242_v24 = vld [vmem:[#allocation8 + $0x274] sm:$0xf]  ;;  %v3266_v49 = vor.u32 %v4210_v36, %v3263_v37  ;;  %v3335_v16 = vld [vmem:[#allocation8 + $0x208] sm:$0xf0] }
  0xe7   :  { %v3394_v54 = vor.u32 %v4242_v24, %v3391_v41  ;;  %v4234_v36 = vld [vmem:[#allocation8 + $0x234] sm:$0xf]  ;;  %v3359_v37 = vld [vmem:[#allocation8 + $0x238] sm:$0xf0]  ;;  %v3223_v41 = vld [vmem:[#allocation8 + $0x128] sm:$0xf0] }
  0xe8   :  { %v3362_v42 = vor.u32 %v4234_v36, %v3359_v37 }
  0xe9   :  { %1379 = vmatpush.bf16.msrb.mxu0 %v3366_v45  ;;  %1392 = vmatpush.bf16.msrb.mxu1 %v3430_v47  ;;  %v3146_v45 = vor.u32 %v4180_v23, %v3143_v35  ;;  %v4447_v47 = vld [vmem:[#allocation5 + $0x20] sm:$0xff]  ;;  %v3295_v35 = vld [vmem:[#allocation8 + $0x1b8] sm:$0xf0] }
  0xea   :  { %1405 = vmatpush.bf16.msrb.mxu2 %v3114_v60  ;;  %1418 = vmatpush.bf16.msrb.mxu3 %v3178_v50  ;;  %v734_v48 = vmul.f32 %v4447_v47, %v4845_v46  ;;  %v3330_v60 = vor.u32 %v4226_v38, %v3327_v39  ;;  %v4448_v50 = vld [vmem:[#allocation5 + $0x28] sm:$0xff]  ;;  %v4218_v23 = vld [vmem:[#allocation8 + $0x1b4] sm:$0xf]  ;;  %v4232_v47 = vld [vmem:[#allocation8 + $0x224] sm:$0xf] }
  0xeb   :  { %v735_v51 = vmul.f32 %v4448_v50, %v4845_v46  ;;  %v3258_v46 = vor.u32 %v4208_v52, %v3255_v53  ;;  %v4250_v38 = vld [vmem:[#allocation8 + $0x2b4] sm:$0xf]  ;;  %v3423_v39 = vld [vmem:[#allocation8 + $0x2b8] sm:$0xf0] }
  0xec   :  { %v3426_v43 = vor.u32 %v4250_v38, %v3423_v39  ;;  %v4198_v52 = vld [vmem:[#allocation8 + $0x114] sm:$0xf]  ;;  %v3215_v53 = vld [vmem:[#allocation8 + $0x118] sm:$0xf0] }
  0xed   :  { %1380 = vmatpush.bf16.msrb.mxu0 %v3358_v57  ;;  %1393 = vmatpush.bf16.msrb.mxu1 %v3422_v58  ;;  %v3319_v57 = vld [vmem:[#allocation8 + $0x1e8] sm:$0xf0]  ;;  %v4240_v58 = vld [vmem:[#allocation8 + $0x264] sm:$0xf]  ;;  %v4871_v63 = vpack.c.bf16 %v735_v51, %v735_v51 }
  0xee   :  { %1406 = vmatpush.bf16.msrb.mxu2 %v3106_v61  ;;  %1419 = vmatpush.bf16.msrb.mxu3 %v3170_v62  ;;  %v3447_v61 = vld [vmem:[#allocation8 + $0x2e8] sm:$0xf0]  ;;  %v4869_v62 = vpack.c.bf16 %v734_v48, %v734_v48  ;;  %v3322_v0 = vor.u32 %v4224_v56, %v3319_v57  ;;  %v3386_v7 = vor.u32 %v4240_v58, %v3383_v59  ;;  %v4214_v56 = vld [vmem:[#allocation8 + $0x194] sm:$0xf]  ;;  %v3279_v57 = vld [vmem:[#allocation8 + $0x198] sm:$0xf0] }
  0xef   :  { %v3450_v12 = vor.u32 %v4256_v29, %v3447_v61  ;;  %v3351_v48 = vld [vmem:[#allocation8 + $0x228] sm:$0xf0]  ;;  %v4230_v58 = vld [vmem:[#allocation8 + $0x214] sm:$0xf]  ;;  %v3343_v59 = vld [vmem:[#allocation8 + $0x218] sm:$0xf0] }
  0xf0   :  { %v4246_v29 = vld [vmem:[#allocation8 + $0x294] sm:$0xf]  ;;  %v3407_v61 = vld [vmem:[#allocation8 + $0x298] sm:$0xf0] }
  0xf1   :  { %1381 = vmatpush.bf16.msrb.mxu0 %v3350_v13  ;;  %1394 = vmatpush.bf16.msrb.mxu1 %v3414_v14  ;;  %v4222_v13 = vld [vmem:[#allocation8 + $0x1d4] sm:$0xf]  ;;  %v3311_v14 = vld [vmem:[#allocation8 + $0x1d8] sm:$0xf0] }
  0xf2   :  { %1407 = vmatpush.bf16.msrb.mxu2 %v3098_v17  ;;  %1420 = vmatpush.bf16.msrb.mxu3 %v3162_v18  ;;  %v4254_v17 = vld [vmem:[#allocation8 + $0x2d4] sm:$0xf]  ;;  %v3439_v18 = vld [vmem:[#allocation8 + $0x2d8] sm:$0xf0]  ;;  %v3314_v19 = vor.u32 %v4222_v13, %v3311_v14  ;;  %v4212_v13 = vld [vmem:[#allocation8 + $0x184] sm:$0xf] }
  0xf3   :  { %v3442_v2 = vor.u32 %v4254_v17, %v3439_v18  ;;  %v3271_v14 = vld [vmem:[#allocation8 + $0x188] sm:$0xf0]  ;;  %v4244_v17 = vld [vmem:[#allocation8 + $0x284] sm:$0xf] }
  0xf4   :  { %v3399_v18 = vld [vmem:[#allocation8 + $0x288] sm:$0xf0] }
  0xf5   :  { %1382 = vmatpush.bf16.msrb.mxu0 %v3342_v3  ;;  %1395 = vmatpush.bf16.msrb.mxu1 %v3406_v28  ;;  %v3303_v3 = vld [vmem:[#allocation8 + $0x1c8] sm:$0xf0]  ;;  %v4236_v28 = vld [vmem:[#allocation8 + $0x244] sm:$0xf] }
  0xf6   :  { %1408 = vmatpush.bf16.msrb.mxu2 %v3090_v32  ;;  %1421 = vmatpush.bf16.msrb.mxu3 %v3154_v33  ;;  %v4202_v32 = vld [vmem:[#allocation8 + $0x134] sm:$0xf]  ;;  %v3231_v33 = vld [vmem:[#allocation8 + $0x138] sm:$0xf0]  ;;  %v3370_v34 = vor.u32 %v4236_v28, %v3367_v4 }
  0xf7   :  { %v3234_v24 = vor.u32 %v4202_v32, %v3231_v33  ;;  %v3509_v32 = vld [vmem:[#allocation11 + $0x60] sm:$0xf]  ;;  %v4273_v33 = vld [vmem:[#allocation11 + $0x64] sm:$0xf0] }
  0xf9   :  { %1383 = vmatpush.bf16.msrb.mxu0 %v3334_v25  ;;  %1396 = vmatpush.bf16.msrb.mxu1 %v3398_v40  ;;  %v3298_v25 = vor.u32 %v4218_v23, %v3295_v35  ;;  %v4200_v40 = vld [vmem:[#allocation8 + $0x124] sm:$0xf]  ;;  %v3511_v23 = vld [vmem:[#allocation11 + $0x68] sm:$0xf0] }
  0xfa   :  { %1409 = vmatpush.bf16.msrb.mxu2 %v3082_v44  ;;  %1422 = vmatpush.bf16.msrb.mxu3 %v3146_v45  ;;  %v4216_v44 = vld [vmem:[#allocation8 + $0x1a4] sm:$0xf]  ;;  %v3287_v45 = vld [vmem:[#allocation8 + $0x1a8] sm:$0xf0]  ;;  %v3226_v50 = vor.u32 %v4200_v40, %v3223_v41  ;;  %v4271_v40 = vld [vmem:[#allocation11 + $0x54] sm:$0xf0] }
  0xfb   :  { %v3290_v51 = vor.u32 %v4216_v44, %v3287_v45  ;;  %v4270_v41 = vld [vmem:[#allocation11 + $0x54] sm:$0xf] }
  0xfc   :  { %1384 = vmatmul.bf16.vlgmr.msrb.gmra.mxu0 %v4869_v62  ;;  %1397 = vmatmul.bf16.vlgmr.msrb.gmra.mxu1 %v4871_v63 }
  0xfd   :  { %1428 = vmatpush.bf16.msra.mxu0 %v3266_v49  ;;  %1441 = vmatpush.bf16.msra.mxu1 %v3330_v60  ;;  %v4248_v49 = vld [vmem:[#allocation8 + $0x2a4] sm:$0xf]  ;;  %v3415_v60 = vld [vmem:[#allocation8 + $0x2a8] sm:$0xf0] }
  0xfe   :  { %1454 = vmatpush.bf16.msra.mxu2 %v3394_v54  ;;  %1467 = vmatpush.bf16.msra.mxu3 %v3458_v55  ;;  %v3354_v54 = vor.u32 %v4232_v47, %v3351_v48  ;;  %v3418_v55 = vor.u32 %v4248_v49, %v3415_v60  ;;  %v3493_v47 = vld [vmem:[#allocation11 + $0x40] sm:$0xf]  ;;  %v4269_v48 = vld [vmem:[#allocation11 + $0x44] sm:$0xf0]  ;;  %v4268_v49 = vld [vmem:[#allocation11 + $0x44] sm:$0xf] }
  0xff   :  { %1410 = vmatmul.bf16.vlgmr.msrb.gmra.mxu2 %v4855_v1  ;;  %1423 = vmatmul.bf16.vlgmr.msrb.gmra.mxu3 %v4857_v10  ;;  %v3242_v1 = vor.u32 %v4204_v9, %v3239_v20  ;;  %v3306_v10 = vor.u32 %v4220_v27, %v3303_v3  ;;  %v3338_v9 = vor.u32 %v4228_v15, %v3335_v16  ;;  %v3495_v60 = vld [vmem:[#allocation11 + $0x48] sm:$0xf0] }
 0x100   :  { %v3402_v20 = vor.u32 %v4244_v17, %v3399_v18  ;;  %v3479_v15 = vld [vmem:[#allocation11 + $0x28] sm:$0xf0] }
 0x101   :  { %1429 = vmatpush.bf16.msra.mxu0 %v3258_v46  ;;  %1442 = vmatpush.bf16.msra.mxu1 %v3322_v0  ;;  %v3218_v46 = vor.u32 %v4198_v52, %v3215_v53  ;;  %v3282_v0 = vor.u32 %v4214_v56, %v3279_v57  ;;  %v3498_v53 = vor.u32 %v4268_v49, %v3495_v60  ;;  %v3565_v49 = vld [vmem:[#allocation11 + $0xd0] sm:$0xf]  ;;  %v4287_v60 = vld [vmem:[#allocation11 + $0xd4] sm:$0xf0] }
 0x102   :  { %1455 = vmatpush.bf16.msra.mxu2 %v3386_v7  ;;  %1468 = vmatpush.bf16.msra.mxu3 %v3450_v12  ;;  %v3346_v7 = vor.u32 %v4230_v58, %v3343_v59  ;;  %v3410_v12 = vor.u32 %v4246_v29, %v3407_v61  ;;  %v4266_v59 = vld [vmem:[#allocation11 + $0x34] sm:$0xf]  ;;  %v3487_v29 = vld [vmem:[#allocation11 + $0x38] sm:$0xf0] }
 0x105   :  { %1430 = vmatpush.bf16.msra.mxu0 %v3250_v8  ;;  %1443 = vmatpush.bf16.msra.mxu1 %v3314_v19  ;;  %v3210_v8 = vor.u32 %v4196_v5, %v3207_v6  ;;  %v3274_v19 = vor.u32 %v4212_v13, %v3271_v14  ;;  %v4264_v13 = vld [vmem:[#allocation11 + $0x24] sm:$0xf] }
 0x106   :  { %1456 = vmatpush.bf16.msra.mxu2 %v3378_v21  ;;  %1469 = vmatpush.bf16.msra.mxu3 %v3442_v2  ;;  %v3482_v16 = vor.u32 %v4264_v13, %v3479_v15 }
 0x109   :  { %1431 = vmatpush.bf16.msra.mxu0 %v3242_v1  ;;  %1444 = vmatpush.bf16.msra.mxu1 %v3306_v10  ;;  %v3519_v1 = vld [vmem:[#allocation11 + $0x78] sm:$0xf0] }
 0x10a   :  { %1457 = vmatpush.bf16.msra.mxu2 %v3370_v34  ;;  %1470 = vmatpush.bf16.msra.mxu3 %v3434_v22  ;;  %v4272_v34 = vld [vmem:[#allocation11 + $0x64] sm:$0xf]  ;;  %v3510_v22 = vor.u32 %v4273_v33, %v3509_v32  ;;  %v4897_v33 = vld [vmem:[#allocation10] sm:$0x3] }
 0x10b   :  { %v3514_v37 = vor.u32 %v4272_v34, %v3511_v23  ;;  %v840_v23 = vperm.slane %v4897_v33, 0 }
 0x10d   :  { %1432 = vmatpush.bf16.msra.mxu0 %v3234_v24  ;;  %1445 = vmatpush.bf16.msra.mxu1 %v3298_v25  ;;  %v3501_v25 = vld [vmem:[#allocation11 + $0x50] sm:$0xf] }
 0x10e   :  { %1458 = vmatpush.bf16.msra.mxu2 %v3362_v42  ;;  %1471 = vmatpush.bf16.msra.mxu3 %v3426_v43  ;;  %v3502_v42 = vor.u32 %v4271_v40, %v3501_v25  ;;  %v3503_v43 = vld [vmem:[#allocation11 + $0x58] sm:$0xf0]  ;;  %v4289_v25 = vld [vmem:[#allocation11 + $0xe4] sm:$0xf0] }
 0x10f   :  { %v3506_v45 = vor.u32 %v4270_v41, %v3503_v43  ;;  %v4288_v41 = vld [vmem:[#allocation11 + $0xe4] sm:$0xf] }
 0x111   :  { %1433 = vmatpush.bf16.msra.mxu0 %v3226_v50  ;;  %1446 = vmatpush.bf16.msra.mxu1 %v3290_v51  ;;  %v3494_v50 = vor.u32 %v4269_v48, %v3493_v47 }
 0x112   :  { %1459 = vmatpush.bf16.msra.mxu2 %v3354_v54  ;;  %1472 = vmatpush.bf16.msra.mxu3 %v3418_v55  ;;  %v3485_v54 = vld [vmem:[#allocation11 + $0x30] sm:$0xf]  ;;  %v4267_v55 = vld [vmem:[#allocation11 + $0x34] sm:$0xf0] }
 0x115   :  { %1434 = vmatpush.bf16.msra.mxu0 %v3218_v46  ;;  %1447 = vmatpush.bf16.msra.mxu1 %v3282_v0  ;;  %v3486_v46 = vor.u32 %v4267_v55, %v3485_v54  ;;  %v3490_v0 = vor.u32 %v4266_v59, %v3487_v29  ;;  %v3566_v54 = vor.u32 %v4287_v60, %v3565_v49  ;;  %v3559_v59 = vld [vmem:[#allocation11 + $0xc8] sm:$0xf0] }
 0x116   :  { %1460 = vmatpush.bf16.msra.mxu2 %v3346_v7  ;;  %1473 = vmatpush.bf16.msra.mxu3 %v3410_v12  ;;  %v3477_v7 = vld [vmem:[#allocation11 + $0x20] sm:$0xf]  ;;  %v4265_v12 = vld [vmem:[#allocation11 + $0x24] sm:$0xf0] }
 0x117   :  { %v3478_v14 = vor.u32 %v4265_v12, %v3477_v7  ;;  %v4283_v7 = vld [vmem:[#allocation11 + $0xb4] sm:$0xf0]  ;;  %v4282_v12 = vld [vmem:[#allocation11 + $0xb4] sm:$0xf] }
 0x119   :  { %1435 = vmatpush.bf16.msra.mxu0 %v3210_v8  ;;  %1448 = vmatpush.bf16.msra.mxu1 %v3274_v19  ;;  %v3469_v8 = vld [vmem:[#allocation11 + $0x10] sm:$0xf]  ;;  %v4263_v19 = vld [vmem:[#allocation11 + $0x14] sm:$0xf0] }
 0x11a   :  { %1461 = vmatpush.bf16.msra.mxu2 %v3338_v9  ;;  %1474 = vmatpush.bf16.msra.mxu3 %v3402_v20  ;;  %v4262_v9 = vld [vmem:[#allocation11 + $0x14] sm:$0xf]  ;;  %v3470_v20 = vor.u32 %v4263_v19, %v3469_v8  ;;  %v3541_v19 = vld [vmem:[#allocation11 + $0xa0] sm:$0xf] }
 0x11c   :  { %1436 = vmatmul.bf16.vlgmr.msra.gmra.mxu0 %v4859_v11  ;;  %1449 = vmatmul.bf16.vlgmr.msra.gmra.mxu1 %v4861_v26  ;;  %v4892_v11 = vld [vmem:[%s4971_s3] sm:$0x3]  ;;  %v3517_v26 = vld [vmem:[#allocation11 + $0x70] sm:$0xf] }
 0x11d   :  { %1462 = vmatmul.bf16.vlgmr.msra.gmra.mxu2 %v4869_v62  ;;  %1475 = vmatmul.bf16.vlgmr.msra.gmra.mxu3 %v4871_v63  ;;  %v4274_v62 = vld [vmem:[#allocation11 + $0x74] sm:$0xf]  ;;  %v267_v63 = vperm.slane %v4892_v11, 1  ;;  %v3518_v31 = vor.u32 %v4275_v30, %v3517_v26  ;;  %v3461_v26 = vld [vmem:[#allocation11] sm:$0xf]  ;;  %v266_v43 = vperm.slane %v4892_v11, 0 }
 0x11e   :  { %v3522_v10 = vor.u32 %v4274_v62, %v3519_v1  ;;  %v4261_v30 = vld [vmem:[#allocation11 + $0x4] sm:$0xf0]  ;;  %v4260_v62 = vld [vmem:[#allocation11 + $0x4] sm:$0xf] }
 0x11f   :  { %1688 = vmatpush.bf16.msrb.mxu0 %v3518_v31  ;;  %v3463_v31 = vld [vmem:[#allocation11 + $0x8] sm:$0xf0] }
 0x120   :  { %1714 = vmatpush.bf16.msrb.mxu2 %v3522_v10  ;;  %v3466_v32 = vor.u32 %v4260_v62, %v3463_v31  ;;  %v3533_v62 = vld [vmem:[#allocation11 + $0x90] sm:$0xf]  ;;  %v4278_v31 = vld [vmem:[#allocation11 + $0x94] sm:$0xf] }
 0x123   :  { %1689 = vmatpush.bf16.msrb.mxu0 %v3510_v22 }
 0x124   :  { %1715 = vmatpush.bf16.msrb.mxu2 %v3514_v37  ;;  %v4290_v37 = vld [vmem:[#allocation11 + $0xf4] sm:$0xf] }
 0x127   :  { %1690 = vmatpush.bf16.msrb.mxu0 %v3502_v42  ;;  %v3575_v42 = vld [vmem:[#allocation11 + $0xe8] sm:$0xf0] }
 0x128   :  { %1716 = vmatpush.bf16.msrb.mxu2 %v3506_v45  ;;  %v3578_v48 = vor.u32 %v4288_v41, %v3575_v42  ;;  %v3527_v42 = vld [vmem:[#allocation11 + $0x88] sm:$0xf0] }
 0x12b   :  { %1691 = vmatpush.bf16.msrb.mxu0 %v3494_v50 }
 0x12c   :  { %1717 = vmatpush.bf16.msrb.mxu2 %v3498_v53 }
 0x12f   :  { %1692 = vmatpush.bf16.msrb.mxu0 %v3486_v46 }
 0x130   :  { %1718 = vmatpush.bf16.msrb.mxu2 %v3490_v0 }
 0x133   :  { %1693 = vmatpush.bf16.msrb.mxu0 %v3478_v14 }
 0x134   :  { %1719 = vmatpush.bf16.msrb.mxu2 %v3482_v16  ;;  %v3551_v16 = vld [vmem:[#allocation11 + $0xb8] sm:$0xf0] }
 0x137   :  { %1694 = vmatpush.bf16.msrb.mxu0 %v3470_v20 }
 0x138   :  { %v4881_v21 = vpop.f32.mrf.mxu0  ;;  %v4883_v2 = vpop.f32.mrf.mxu1 }
 0x139   :  { %v600_v53 = vadd.f32 %v4881_v21, %v266_v43  ;;  %v3549_v21 = vld [vmem:[#allocation11 + $0xb0] sm:$0xf] }
 0x13a   :  { %v3550_v15 = vor.u32 %v4283_v7, %v3549_v21 }
 0x13b   :  { %v613_v29 = vadd.f32 %v4883_v2, %v600_v53  ;;  %v3554_v2 = vor.u32 %v4282_v12, %v3551_v16 }
 0x13f   :  { %v4885_v27 = vpop.f32.mrf.mxu2  ;;  %v4887_v3 = vpop.f32.mrf.mxu3 }
 0x140   :  { %v601_v28 = vpop.f32.mrf.mxu0  ;;  %v614_v4 = vpop.f32.mrf.mxu1 }
 0x141   :  { %v3471_v28 = vld [vmem:[#allocation11 + $0x18] sm:$0xf0] }
 0x142   :  { %v3474_v4 = vor.u32 %v4262_v9, %v3471_v28  ;;  %v4281_v9 = vld [vmem:[#allocation11 + $0xa4] sm:$0xf0] }
 0x144   :  { %1720 = vmatpush.bf16.msrb.mxu2 %v3474_v4  ;;  %v3542_v4 = vor.u32 %v4281_v9, %v3541_v19 }
 0x147   :  { %v627_v35 = vpop.f32.mrf.mxu2  ;;  %v640_v36 = vpop.f32.mrf.mxu3 }
 0x148   :  { %v651_v38 = vpop.f32.mrf.mxu0  ;;  %v664_v39 = vpop.f32.mrf.mxu1  ;;  %1721 = vmatpush.bf16.msrb.mxu2 %v3466_v32  ;;  %v3581_v35 = vld [vmem:[#allocation11 + $0xf0] sm:$0xf]  ;;  %v4291_v36 = vld [vmem:[#allocation11 + $0xf4] sm:$0xf0] }
 0x149   :  { %v652_v24 = vadd.f32 %v651_v38, %v267_v63  ;;  %v3462_v63 = vor.u32 %v4261_v30, %v3461_v26  ;;  %v3582_v38 = vor.u32 %v4291_v36, %v3581_v35  ;;  %v3543_v26 = vld [vmem:[#allocation11 + $0xa8] sm:$0xf0] }
 0x14b   :  { %v665_v44 = vadd.f32 %v664_v39, %v652_v24  ;;  %1695 = vmatpush.bf16.msrb.mxu0 %v3462_v63  ;;  %v3583_v39 = vld [vmem:[#allocation11 + $0xf8] sm:$0xf0]  ;;  %v3573_v24 = vld [vmem:[#allocation11 + $0xe0] sm:$0xf]  ;;  %1701 = vmatpush.bf16.msrb.mxu1 %v3582_v38  ;;  %v4279_v63 = vld [vmem:[#allocation11 + $0x94] sm:$0xf0] }
 0x14c   :  { %v3586_v40 = vor.u32 %v4290_v37, %v3583_v39  ;;  %v3574_v47 = vor.u32 %v4289_v25, %v3573_v24  ;;  %v3525_v24 = vld [vmem:[#allocation11 + $0x80] sm:$0xf]  ;;  %v4277_v25 = vld [vmem:[#allocation11 + $0x84] sm:$0xf0] }
 0x14d   :  { %v3526_v41 = vor.u32 %v4277_v25, %v3525_v24  ;;  %v4316_v24 = vld [vmem:[#allocation13 + $0xc4] sm:$0xf]  ;;  %v3687_v25 = vld [vmem:[#allocation13 + $0xd0] sm:$0xf0] }
 0x14e   :  { %1727 = vmatpush.bf16.msrb.mxu3 %v3586_v40  ;;  %v4276_v40 = vld [vmem:[#allocation11 + $0x84] sm:$0xf] }
 0x14f   :  { %v677_v51 = vpop.f32.mrf.mxu2  ;;  %v690_v52 = vpop.f32.mrf.mxu3  ;;  %1702 = vmatpush.bf16.msrb.mxu1 %v3574_v47  ;;  %v3530_v43 = vor.u32 %v4276_v40, %v3527_v42  ;;  %v841_v47 = vperm.slane %v4897_v33, 1  ;;  %v4348_v40 = vld [vmem:[#allocation13 + $0x1c4] sm:$0xf]  ;;  %v3815_v42 = vld [vmem:[#allocation13 + $0x1d0] sm:$0xf0] }
 0x150   :  { %v678_v56 = vadd.f32 %v677_v51, %v665_v44  ;;  %v653_v57 = vpop.f32.mrf.mxu0  ;;  %v666_v58 = vpop.f32.mrf.mxu1  ;;  %v4286_v51 = vld [vmem:[#allocation11 + $0xd4] sm:$0xf] }
 0x151   :  { %v4285_v57 = vld [vmem:[#allocation11 + $0xc4] sm:$0xf0]  ;;  %v4284_v58 = vld [vmem:[#allocation11 + $0xc4] sm:$0xf] }
 0x152   :  { %v4895_v61 = vadd.f32 %v690_v52, %v678_v56  ;;  %v3567_v52 = vld [vmem:[#allocation11 + $0xd8] sm:$0xf0]  ;;  %1728 = vmatpush.bf16.msrb.mxu3 %v3578_v48  ;;  %v3557_v56 = vld [vmem:[#allocation11 + $0xc0] sm:$0xf]  ;;  %v3562_v0 = vor.u32 %v4284_v58, %v3559_v59 }
 0x153   :  { %v3570_v55 = vor.u32 %v4286_v51, %v3567_v52  ;;  %1703 = vmatpush.bf16.msrb.mxu1 %v3566_v54  ;;  %v3558_v46 = vor.u32 %v4285_v57, %v3557_v56 }
 0x154   :  { %vm695_vm8 = vcmp.ge.f32.partialorder %v4895_v61, 0.0 }
 0x156   :  { %1729 = vmatpush.bf16.msrb.mxu3 %v3570_v55 }
 0x157   :  { %v679_v5 = vpop.f32.mrf.mxu2  ;;  %v692_v6 = vpop.f32.mrf.mxu3  ;;  %1704 = vmatpush.bf16.msrb.mxu1 %v3558_v46 }
 0x158   :  { %v626_v5 = vadd.f32 %v4885_v27, %v613_v29  ;;  %v4280_v27 = vld [vmem:[#allocation11 + $0xa4] sm:$0xf] }
 0x159   :  { %v1333_v17 = vpop.f32.mrf.mxu0  ;;  %v1346_v18 = vpop.f32.mrf.mxu1  ;;  %v3546_v30 = vor.u32 %v4280_v27, %v3543_v26  ;;  %v3829_v26 = vld [vmem:[#allocation13 + $0x1e0] sm:$0xf] }
 0x15a   :  { %v1334_v50 = vadd.f32 %v1333_v17, %v840_v23  ;;  %1730 = vmatpush.bf16.msrb.mxu3 %v3562_v0  ;;  %v639_v13 = vadd.f32 %v4887_v3, %v626_v5  ;;  %v3535_v23 = vld [vmem:[#allocation11 + $0x98] sm:$0xf0] }
 0x15b   :  { %1705 = vmatpush.bf16.msrb.mxu1 %v3550_v15  ;;  %v3538_v38 = vor.u32 %v4278_v31, %v3535_v23  ;;  %v4318_v23 = vld [vmem:[#allocation13 + $0xcc] sm:$0xf0] }
 0x15c   :  { %v1347_v11 = vadd.f32 %v1346_v18, %v1334_v50  ;;  %v696_v20 = vmul.f32 0.01, %v639_v13  ;;  %vm694_vm6 = vcmp.ge.f32.partialorder %v639_v13, 0.0 }
 0x15e   :  { %1731 = vmatpush.bf16.msrb.mxu3 %v3554_v2 }
 0x15f   :  { %1706 = vmatpush.bf16.msrb.mxu1 %v3542_v4  ;;  %v4322_v4 = vld [vmem:[#allocation13 + $0xec] sm:$0xf0] }
 0x161   :  { %v1335_v34 = vpop.f32.mrf.mxu0  ;;  %v1348_v22 = vpop.f32.mrf.mxu1 }
 0x162   :  { %v1359_v1 = vpop.f32.mrf.mxu2  ;;  %v1372_v10 = vpop.f32.mrf.mxu3  ;;  %1732 = vmatpush.bf16.msrb.mxu3 %v3546_v30  ;;  %v3534_v22 = vor.u32 %v4279_v63, %v3533_v62  ;;  %v4320_v62 = vld [vmem:[#allocation13 + $0xe4] sm:$0xf]  ;;  %v3703_v63 = vld [vmem:[#allocation13 + $0xf0] sm:$0xf0] }
 0x163   :  { %v1360_v6 = vadd.f32 %v1359_v1, %v1347_v11  ;;  %v698_v1 = vsel %vm694_vm6, %v639_v13, %v696_v20  ;;  %v697_v11 = vmul.f32 0.01, %v4895_v61 }
 0x164   :  { %1707 = vmatpush.bf16.msrb.mxu1 %v3534_v22 }
 0x165   :  { %v1373_v14 = vadd.f32 %v1372_v10, %v1360_v6  ;;  %v699_v33 = vsel %vm695_vm8, %v4895_v61, %v697_v11 }
 0x166   :  { %1733 = vmatpush.bf16.msrb.mxu3 %v3538_v38 }
 0x168   :  { %1708 = vmatpush.bf16.msrb.mxu1 %v3526_v41  ;;  %v3690_v41 = vor.u32 %v4316_v24, %v3687_v25  ;;  %v3733_v24 = vld [vmem:[#allocation13 + $0x120] sm:$0xf] }
 0x16a   :  { %v1361_v44 = vpop.f32.mrf.mxu2  ;;  %v1374_v45 = vpop.f32.mrf.mxu3  ;;  %1734 = vmatpush.bf16.msrb.mxu3 %v3530_v43  ;;  %v3669_v43 = vld [vmem:[#allocation13 + $0xa0] sm:$0xf] }
 0x179   :  { %v1385_v17 = vpop.f32.mrf.mxu0  ;;  %v1398_v18 = vpop.f32.mrf.mxu1 }
 0x17a   :  { %v1386_v8 = vadd.f32 %v1385_v17, %v1373_v14  ;;  %v1522_v14 = vld [vmem:[%s4975_s7] sm:$0x3] }
 0x17b   :  { %v1524_v61 = vperm.slane %v1522_v14, 0  ;;  %v1525_v16 = vperm.slane %v1522_v14, 1 }
 0x17c   :  { %v1399_v28 = vadd.f32 %v1398_v18, %v1386_v8 }
 0x17e   :  { %vm1480_vm7 = vcmp.ge.f32.partialorder %v1399_v28, 0.0  ;;  %v1482_v3 = vmul.f32 0.01, %v1399_v28 }
 0x180   :  { %v1484_v10 = vsel %vm1480_vm7, %v1399_v28, %v1482_v3  ;;  %v3701_v28 = vld [vmem:[#allocation13 + $0xe0] sm:$0xf]  ;;  %v4354_v3 = vld [vmem:[#allocation13 + $0x1ec] sm:$0xf0] }
 0x181   :  { %v4905_v35 = vmul.f32 %v1484_v10, %v698_v1  ;;  %v1387_v36 = vpop.f32.mrf.mxu0  ;;  %v1400_v37 = vpop.f32.mrf.mxu1  ;;  %v3702_v30 = vor.u32 %v4322_v4, %v3701_v28  ;;  %v3830_v31 = vor.u32 %v4354_v3, %v3829_v26  ;;  %v3706_v1 = vor.u32 %v4320_v62, %v3703_v63  ;;  %v4352_v10 = vld [vmem:[#allocation13 + $0x1e4] sm:$0xf]  ;;  %v4302_v28 = vld [vmem:[#allocation13 + $0x4c] sm:$0xf0]  ;;  %v3749_v4 = vld [vmem:[#allocation13 + $0x140] sm:$0xf] }
 0x182   :  { %v1411_v32 = vpop.f32.mrf.mxu2  ;;  %v1424_v34 = vpop.f32.mrf.mxu3  ;;  %v3813_v36 = vld [vmem:[#allocation13 + $0x1c0] sm:$0xf]  ;;  %v4350_v37 = vld [vmem:[#allocation13 + $0x1cc] sm:$0xf0]  ;;  %v4300_v62 = vld [vmem:[#allocation13 + $0x44] sm:$0xf] }
 0x183   :  { %v1488_v39 = vpack.c.bf16 %v4905_v35, %v4905_v35  ;;  %v1412_v48 = vadd.f32 %v1411_v32, %v841_v47  ;;  %v3831_v32 = vld [vmem:[#allocation13 + $0x1f0] sm:$0xf0]  ;;  %2153 = vmatpush.bf16.msra.mxu0 %v3702_v30  ;;  %2166 = vmatpush.bf16.msra.mxu1 %v3830_v31  ;;  %v3797_v47 = vld [vmem:[#allocation13 + $0x1a0] sm:$0xf]  ;;  %v4334_v3 = vld [vmem:[#allocation13 + $0x14c] sm:$0xf0] }
 0x184   :  { %v3834_v22 = vor.u32 %v4352_v10, %v3831_v32  ;;  %2179 = vmatpush.bf16.msra.mxu2 %v3706_v1  ;;  %v3623_v63 = vld [vmem:[#allocation13 + $0x50] sm:$0xf0]  ;;  %v4332_v10 = vld [vmem:[#allocation13 + $0x144] sm:$0xf] }
 0x185   :  { %1696 = vmatmul.bf16.vlgmr.msrb.gmra.mxu0 %v1488_v39  ;;  %1722 = vmatmul.bf16.vlgmr.msrb.gmra.mxu2 %v1488_v39  ;;  %v1425_v49 = vadd.f32 %v1424_v34, %v1412_v48  ;;  %v3685_v34 = vld [vmem:[#allocation13 + $0xc0] sm:$0xf]  ;;  %v3814_v39 = vor.u32 %v4350_v37, %v3813_v36  ;;  %v4346_v48 = vld [vmem:[#allocation13 + $0x1ac] sm:$0xf0]  ;;  %v3751_v32 = vld [vmem:[#allocation13 + $0x150] sm:$0xf0] }
 0x186   :  { %v3686_v38 = vor.u32 %v4318_v23, %v3685_v34  ;;  %2192 = vmatpush.bf16.msra.mxu3 %v3834_v22  ;;  %v3605_v22 = vld [vmem:[#allocation13 + $0x20] sm:$0xf]  ;;  %v4298_v23 = vld [vmem:[#allocation13 + $0x2c] sm:$0xf0]  ;;  %v3754_v25 = vor.u32 %v4332_v10, %v3751_v32  ;;  %v4347_v32 = vld [vmem:[#allocation13 + $0x1b4] sm:$0xf0] }
 0x187   :  { %2167 = vmatpush.bf16.msra.mxu1 %v3814_v39  ;;  %v3626_v39 = vor.u32 %v4300_v62, %v3623_v63  ;;  %v3677_v63 = vld [vmem:[#allocation13 + $0xa8] sm:$0xf] }
 0x188   :  { %2154 = vmatpush.bf16.msra.mxu0 %v3686_v38  ;;  %2180 = vmatpush.bf16.msra.mxu2 %v3690_v41  ;;  %v3750_v38 = vor.u32 %v4334_v3, %v3749_v4  ;;  %v4296_v41 = vld [vmem:[#allocation13 + $0x24] sm:$0xf]  ;;  %v3823_v3 = vld [vmem:[#allocation13 + $0x1d8] sm:$0xf0] }
 0x18a   :  { %v1413_v44 = vpop.f32.mrf.mxu2  ;;  %v1426_v45 = vpop.f32.mrf.mxu3 }
 0x18b   :  { %v4314_v44 = vld [vmem:[#allocation13 + $0xac] sm:$0xf0]  ;;  %v3818_v45 = vor.u32 %v4348_v40, %v3815_v42  ;;  %v3735_v42 = vld [vmem:[#allocation13 + $0x130] sm:$0xf0] }
 0x18c   :  { %v4330_v40 = vld [vmem:[#allocation13 + $0x12c] sm:$0xf0] }
 0x18d   :  { %2193 = vmatpush.bf16.msra.mxu3 %v3818_v45  ;;  %v3734_v45 = vor.u32 %v4330_v40, %v3733_v24  ;;  %v3661_v24 = vld [vmem:[#allocation13 + $0x88] sm:$0xf] }
 0x18e   :  { %v3789_v40 = vld [vmem:[#allocation13 + $0x188] sm:$0xf] }
 0x199   :  { %v1437_v60 = vpop.f32.mrf.mxu0  ;;  %v1450_v50 = vpop.f32.mrf.mxu1 }
 0x19a   :  { %v1438_v51 = vadd.f32 %v1437_v60, %v1425_v49  ;;  %v4312_v49 = vld [vmem:[#allocation13 + $0xa4] sm:$0xf]  ;;  %v3670_v60 = vor.u32 %v4314_v44, %v3669_v43  ;;  %v3606_v43 = vor.u32 %v4298_v23, %v3605_v22  ;;  %v3589_v44 = vld [vmem:[#allocation13] sm:$0xf]  ;;  %v3679_v22 = vld [vmem:[#allocation13 + $0xb8] sm:$0xf0] }
 0x19c   :  { %v1451_v52 = vadd.f32 %v1450_v50, %v1438_v51  ;;  %v3671_v50 = vld [vmem:[#allocation13 + $0xb0] sm:$0xf0]  ;;  %v4344_v51 = vld [vmem:[#allocation13 + $0x1a4] sm:$0xf]  ;;  %2155 = vmatpush.bf16.msra.mxu0 %v3670_v60  ;;  %v4326_v60 = vld [vmem:[#allocation13 + $0x10c] sm:$0xf0] }
 0x1a0   :  { %v1463_v53 = vpop.f32.mrf.mxu2  ;;  %v1476_v54 = vpop.f32.mrf.mxu3 }
 0x1a1   :  { %v1464_v55 = vadd.f32 %v1463_v53, %v1451_v52  ;;  %v1439_v56 = vpop.f32.mrf.mxu0  ;;  %v1452_v57 = vpop.f32.mrf.mxu1  ;;  %v3799_v52 = vld [vmem:[#allocation13 + $0x1b0] sm:$0xf0]  ;;  %v3798_v53 = vor.u32 %v4346_v48, %v3797_v47  ;;  %v4294_v48 = vld [vmem:[#allocation13 + $0xc] sm:$0xf0] }
 0x1a2   :  { %v4310_v56 = vld [vmem:[#allocation13 + $0x8c] sm:$0xf0]  ;;  %v3781_v57 = vld [vmem:[#allocation13 + $0x180] sm:$0xf]  ;;  %v3802_v11 = vor.u32 %v4344_v51, %v3799_v52  ;;  %v4292_v51 = vld [vmem:[#allocation13 + $0x4] sm:$0xf] }
 0x1a3   :  { %v1477_v58 = vadd.f32 %v1476_v54, %v1464_v55  ;;  %v3674_v54 = vor.u32 %v4312_v49, %v3671_v50  ;;  %v3653_v55 = vld [vmem:[#allocation13 + $0x80] sm:$0xf]  ;;  %2168 = vmatpush.bf16.msra.mxu1 %v3798_v53  ;;  %v3591_v52 = vld [vmem:[#allocation13 + $0x10] sm:$0xf0]  ;;  %v4324_v53 = vld [vmem:[#allocation13 + $0x104] sm:$0xf] }
 0x1a4   :  { %2194 = vmatpush.bf16.msra.mxu3 %v3802_v11  ;;  %v3717_v49 = vld [vmem:[#allocation13 + $0x100] sm:$0xf]  ;;  %v3837_v11 = vld [vmem:[#allocation13 + $0x1e8] sm:$0xf] }
 0x1a5   :  { %vm1481_vm9 = vcmp.ge.f32.partialorder %v1477_v58, 0.0  ;;  %v1483_v59 = vmul.f32 0.01, %v1477_v58  ;;  %2181 = vmatpush.bf16.msra.mxu2 %v3674_v54  ;;  %v3719_v54 = vld [vmem:[#allocation13 + $0x110] sm:$0xf0] }
 0x1a7   :  { %v1485_v29 = vsel %vm1481_vm9, %v1477_v58, %v1483_v59  ;;  %v4342_v58 = vld [vmem:[#allocation13 + $0x18c] sm:$0xf0]  ;;  %v4308_v59 = vld [vmem:[#allocation13 + $0x84] sm:$0xf] }
 0x1a8   :  { %v4913_v46 = vmul.f32 %v1485_v29, %v699_v33  ;;  %v1465_v0 = vpop.f32.mrf.mxu2  ;;  %v1478_v5 = vpop.f32.mrf.mxu3  ;;  %v3655_v33 = vld [vmem:[#allocation13 + $0x90] sm:$0xf0]  ;;  %v4340_v29 = vld [vmem:[#allocation13 + $0x184] sm:$0xf] }
 0x1a9   :  { %v3783_v0 = vld [vmem:[#allocation13 + $0x190] sm:$0xf0]  ;;  %v3654_v5 = vor.u32 %v4310_v56, %v3653_v55  ;;  %v3709_v55 = vld [vmem:[#allocation13 + $0xe8] sm:$0xf]  ;;  %v4323_v56 = vld [vmem:[#allocation13 + $0xf4] sm:$0xf0] }
 0x1aa   :  { %v1489_v6 = vpack.c.bf16 %v4913_v46, %v4913_v46  ;;  %v3786_v14 = vor.u32 %v4340_v29, %v3783_v0  ;;  %v3718_v29 = vor.u32 %v4326_v60, %v3717_v49  ;;  %v3711_v0 = vld [vmem:[#allocation13 + $0xf8] sm:$0xf0]  ;;  %v3645_v49 = vld [vmem:[#allocation13 + $0x68] sm:$0xf]  ;;  %v4307_v60 = vld [vmem:[#allocation13 + $0x74] sm:$0xf0] }
 0x1ab   :  { %2156 = vmatpush.bf16.msra.mxu0 %v3654_v5  ;;  %v4353_v5 = vld [vmem:[#allocation13 + $0x1ec] sm:$0xf] }
 0x1ac   :  { %1709 = vmatmul.bf16.vlgmr.msrb.gmra.mxu1 %v1489_v6  ;;  %1735 = vmatmul.bf16.vlgmr.msrb.gmra.mxu3 %v1489_v6  ;;  %v3782_v6 = vor.u32 %v4342_v58, %v3781_v57  ;;  %v3590_v57 = vor.u32 %v4294_v48, %v3589_v44  ;;  %v4355_v58 = vld [vmem:[#allocation13 + $0x1f4] sm:$0xf0] }
 0x1ad   :  { %2195 = vmatpush.bf16.msra.mxu3 %v3786_v14  ;;  %v3710_v14 = vor.u32 %v4323_v56, %v3709_v55 }
 0x1ae   :  { %2169 = vmatpush.bf16.msra.mxu1 %v3782_v6  ;;  %v3839_v6 = vld [vmem:[#allocation13 + $0x1f8] sm:$0xf0] }
 0x202   :  { %v1697_v21 = vpop.f32.mrf.mxu0 }
 0x203   :  { %v1698_v17 = vadd.f32 %v1697_v21, %v1524_v61  ;;  %v3658_v21 = vor.u32 %v4308_v59, %v3655_v33  ;;  %v4304_v61 = vld [vmem:[#allocation13 + $0x64] sm:$0xf]  ;;  %v4321_v59 = vld [vmem:[#allocation13 + $0xec] sm:$0xf] }
 0x205   :  { %2182 = vmatpush.bf16.msra.mxu2 %v3658_v21 }
 0x208   :  { %v1723_v7 = vpop.f32.mrf.mxu2 }
 0x209   :  { %v1724_v18 = vadd.f32 %v1723_v7, %v1525_v16  ;;  %v3637_v7 = vld [vmem:[#allocation13 + $0x60] sm:$0xf]  ;;  %v3639_v16 = vld [vmem:[#allocation13 + $0x70] sm:$0xf0] }
 0x20a   :  { %v1699_v12 = vpop.f32.mrf.mxu0 }
 0x20b   :  { %v4306_v12 = vld [vmem:[#allocation13 + $0x6c] sm:$0xf0] }
 0x210   :  { %v1725_v13 = vpop.f32.mrf.mxu2 }
 0x211   :  { %v3765_v13 = vld [vmem:[#allocation13 + $0x160] sm:$0xf] }
 0x229   :  { %v1710_v15 = vpop.f32.mrf.mxu1 }
 0x22a   :  { %v4920_v8 = vadd.f32 %v1710_v15, %v1698_v17  ;;  %v4338_v15 = vld [vmem:[#allocation13 + $0x16c] sm:$0xf0]  ;;  %v4336_v17 = vld [vmem:[#allocation13 + $0x164] sm:$0xf] }
 0x22f   :  { %v1736_v2 = vpop.f32.mrf.mxu3 }
 0x230   :  { %v4922_v19 = vadd.f32 %v1736_v2, %v1724_v18  ;;  %v3767_v18 = vld [vmem:[#allocation13 + $0x170] sm:$0xf0]  ;;  %v3638_v2 = vor.u32 %v4306_v12, %v3637_v7  ;;  %v3594_v7 = vor.u32 %v4292_v51, %v3591_v52  ;;  %v3722_v12 = vor.u32 %v4324_v53, %v3719_v54  ;;  %v4339_v52 = vld [vmem:[#allocation13 + $0x174] sm:$0xf0]  ;;  %v4305_v53 = vld [vmem:[#allocation13 + $0x6c] sm:$0xf] }
 0x231   :  { %v1712_v9 = vpop.f32.mrf.mxu1  ;;  %v3770_v30 = vor.u32 %v4336_v17, %v3767_v18  ;;  %v3693_v17 = vld [vmem:[#allocation13 + $0xc8] sm:$0xf]  ;;  %v4319_v18 = vld [vmem:[#allocation13 + $0xd4] sm:$0xf0]  ;;  %v3646_v51 = vor.u32 %v4307_v60, %v3645_v49  ;;  %v3647_v54 = vld [vmem:[#allocation13 + $0x78] sm:$0xf0] }
 0x232   :  { %v1740_v27 = vmax.f32 %v4920_v8, %v4922_v19  ;;  %v3766_v9 = vor.u32 %v4338_v15, %v3765_v13  ;;  %2157 = vmatpush.bf16.msra.mxu0 %v3638_v2  ;;  %v3838_v15 = vor.u32 %v4355_v58, %v3837_v11  ;;  %v3821_v2 = vld [vmem:[#allocation13 + $0x1c8] sm:$0xf]  ;;  %v3650_v56 = vor.u32 %v4305_v53, %v3647_v54  ;;  %v3775_v11 = vld [vmem:[#allocation13 + $0x178] sm:$0xf0]  ;;  %v4093_v49 = vld [vmem:[#allocation14 + $0x1f0] sm:$0xf] }
 0x233   :  { %2196 = vmatpush.bf16.msra.mxu3 %v3770_v30  ;;  %v4349_v30 = vld [vmem:[#allocation13 + $0x1cc] sm:$0xf]  ;;  %v3629_v58 = vld [vmem:[#allocation13 + $0x48] sm:$0xf]  ;;  %v4419_v60 = vld [vmem:[#allocation14 + $0x1f4] sm:$0xf0] }
 0x234   :  { %1741 = vmax.xlane.f32.xlu1 %v1740_v27  ;;  %v3642_v27 = vor.u32 %v4304_v61, %v3639_v16  ;;  %2170 = vmatpush.bf16.msra.mxu1 %v3766_v9  ;;  %v3714_v61 = vor.u32 %v4321_v59, %v3711_v0  ;;  %v3842_v16 = vor.u32 %v4353_v5, %v3839_v6  ;;  %v3757_v0 = vld [vmem:[#allocation13 + $0x148] sm:$0xf]  ;;  %v4335_v5 = vld [vmem:[#allocation13 + $0x154] sm:$0xf0]  ;;  %v3957_v54 = vld [vmem:[#allocation14 + $0xe0] sm:$0xf] }
 0x235   :  { %v3694_v9 = vor.u32 %v4319_v18, %v3693_v17  ;;  %v3826_v62 = vor.u32 %v4349_v30, %v3823_v3  ;;  %v4299_v17 = vld [vmem:[#allocation13 + $0x34] sm:$0xf0]  ;;  %v4369_v53 = vld [vmem:[#allocation14 + $0x64] sm:$0xf0] }
 0x236   :  { %2183 = vmatpush.bf16.msra.mxu2 %v3642_v27  ;;  %v4351_v27 = vld [vmem:[#allocation13 + $0x1d4] sm:$0xf0] }
 0x237   :  { %v1738_v20 = vpop.f32.mrf.mxu3  ;;  %2197 = vmatpush.bf16.msra.mxu3 %v3754_v25  ;;  %v3822_v4 = vor.u32 %v4351_v27, %v3821_v2  ;;  %v4311_v25 = vld [vmem:[#allocation13 + $0x94] sm:$0xf0]  ;;  %v3741_v2 = vld [vmem:[#allocation13 + $0x128] sm:$0xf]  ;;  %v4297_v27 = vld [vmem:[#allocation13 + $0x2c] sm:$0xf] }
 0x238   :  { %v3621_v20 = vld [vmem:[#allocation13 + $0x40] sm:$0xf]  ;;  %2171 = vmatpush.bf16.msra.mxu1 %v3750_v38  ;;  %v3807_v38 = vld [vmem:[#allocation13 + $0x1b8] sm:$0xf0] }
 0x239   :  { %v3622_v34 = vor.u32 %v4302_v28, %v3621_v20  ;;  %v4317_v20 = vld [vmem:[#allocation13 + $0xcc] sm:$0xf]  ;;  %v3695_v28 = vld [vmem:[#allocation13 + $0xd8] sm:$0xf0] }
 0x23a   :  { %2184 = vmatpush.bf16.msra.mxu2 %v3626_v39 }
 0x23b   :  { %2158 = vmatpush.bf16.msra.mxu0 %v3622_v34  ;;  %v4313_v34 = vld [vmem:[#allocation13 + $0xac] sm:$0xf] }
 0x23c   :  { %2172 = vmatpush.bf16.msra.mxu1 %v3734_v45  ;;  %v4341_v45 = vld [vmem:[#allocation13 + $0x18c] sm:$0xf] }
 0x23f   :  { %2159 = vmatpush.bf16.msra.mxu0 %v3606_v43 }
 0x240   :  { %2173 = vmatpush.bf16.msra.mxu1 %v3718_v29  ;;  %v4303_v29 = vld [vmem:[#allocation13 + $0x54] sm:$0xf0] }
 0x241   :  { %v3630_v6 = vor.u32 %v4303_v29, %v3629_v58  ;;  %v4417_v58 = vld [vmem:[#allocation14 + $0x1e4] sm:$0xf0]  ;;  %v3885_v29 = vld [vmem:[#allocation14 + $0x50] sm:$0xf] }
 0x243   :  { %2160 = vmatpush.bf16.msra.mxu0 %v3590_v57  ;;  %v4337_v57 = vld [vmem:[#allocation13 + $0x16c] sm:$0xf] }
 0x244   :  { %2218 = vmatpush.bf16.msrb.mxu1 %v3838_v15  ;;  %v3778_v59 = vor.u32 %v4337_v57, %v3775_v11  ;;  %v4021_v57 = vld [vmem:[#allocation14 + $0x160] sm:$0xf]  ;;  %v4094_v11 = vor.u32 %v4419_v60, %v4093_v49  ;;  %v4370_v49 = vld [vmem:[#allocation14 + $0x74] sm:$0xf]  ;;  %v3903_v60 = vld [vmem:[#allocation14 + $0x78] sm:$0xf0] }
 0x247   :  { %2205 = vmatpush.bf16.msrb.mxu0 %v3710_v14  ;;  %v4333_v14 = vld [vmem:[#allocation13 + $0x14c] sm:$0xf] }
 0x248   :  { %2219 = vmatpush.bf16.msrb.mxu1 %v3822_v4  ;;  %v4329_v4 = vld [vmem:[#allocation13 + $0x12c] sm:$0xf] }
 0x24b   :  { %2206 = vmatpush.bf16.msrb.mxu0 %v3694_v9  ;;  %v4331_v9 = vld [vmem:[#allocation13 + $0x134] sm:$0xf0] }
 0x24c   :  { %v3742_v30 = vor.u32 %v4331_v9, %v3741_v2  ;;  %v4365_v9 = vld [vmem:[#allocation14 + $0x44] sm:$0xf0] }
 0x2a7   :  { %v1742_v26 = vpop.xlane.xlu1 %1741 }
 0x2a8   :  { %v1743_v31 = vsub.f32 %v4920_v8, %v1742_v26  ;;  %v1744_v1 = vsub.f32 %v4922_v19, %v1742_v26  ;;  %v3607_v8 = vld [vmem:[#allocation13 + $0x30] sm:$0xf0]  ;;  %v4328_v19 = vld [vmem:[#allocation13 + $0x124] sm:$0xf]  ;;  %v3698_v26 = vor.u32 %v4317_v20, %v3695_v28  ;;  %v3615_v28 = vld [vmem:[#allocation13 + $0x38] sm:$0xf0] }
 0x2a9   :  { %v3610_v47 = vor.u32 %v4296_v41, %v3607_v8  ;;  %v3738_v50 = vor.u32 %v4328_v19, %v3735_v42  ;;  %v3662_v41 = vor.u32 %v4311_v25, %v3661_v24  ;;  %v4343_v8 = vld [vmem:[#allocation13 + $0x194] sm:$0xf0]  ;;  %v4309_v19 = vld [vmem:[#allocation13 + $0x8c] sm:$0xf]  ;;  %v3663_v42 = vld [vmem:[#allocation13 + $0x98] sm:$0xf0]  ;;  %v3618_v3 = vor.u32 %v4297_v27, %v3615_v28 }
 0x2aa   :  { %v1745_v36 = vmul.f32 1.442695, %v1743_v31  ;;  %v1747_v37 = vmul.f32 1.442695, %v1744_v1  ;;  %v4315_v31 = vld [vmem:[#allocation13 + $0xb4] sm:$0xf0]  ;;  %v3790_v43 = vor.u32 %v4343_v8, %v3789_v40  ;;  %v3666_v44 = vor.u32 %v4309_v19, %v3663_v42 }
 0x2ab   :  { %2185 = vmatpush.bf16.msra.mxu2 %v3610_v47  ;;  %2198 = vmatpush.bf16.msra.mxu3 %v3738_v50  ;;  %v3805_v1 = vld [vmem:[#allocation13 + $0x1a8] sm:$0xf]  ;;  %v3678_v10 = vor.u32 %v4315_v31, %v3677_v63  ;;  %v3791_v47 = vld [vmem:[#allocation13 + $0x198] sm:$0xf0]  ;;  %v4295_v63 = vld [vmem:[#allocation13 + $0x14] sm:$0xf0] }
 0x2ac   :  { %4437 = vpow2.f32 %v1745_v36  ;;  %v3806_v23 = vor.u32 %v4347_v32, %v3805_v1  ;;  %v3682_v36 = vor.u32 %v4313_v34, %v3679_v22  ;;  %v3794_v48 = vor.u32 %v4341_v45, %v3791_v47  ;;  %v3773_v50 = vld [vmem:[#allocation13 + $0x168] sm:$0xf]  ;;  %v4293_v32 = vld [vmem:[#allocation13 + $0xc] sm:$0xf]  ;;  %v3599_v34 = vld [vmem:[#allocation13 + $0x18] sm:$0xf0] }
 0x2ad   :  { %4439 = vpow2.f32 %v1747_v37  ;;  %v4345_v37 = vld [vmem:[#allocation13 + $0x1ac] sm:$0xf]  ;;  %2207 = vmatpush.bf16.msrb.mxu0 %v3678_v10  ;;  %v3774_v55 = vor.u32 %v4339_v52, %v3773_v50  ;;  %v3725_v31 = vld [vmem:[#allocation13 + $0x108] sm:$0xf]  ;;  %v4327_v10 = vld [vmem:[#allocation13 + $0x114] sm:$0xf0] }
 0x2ae   :  { %v3810_v39 = vor.u32 %v4345_v37, %v3807_v38  ;;  %2220 = vmatpush.bf16.msrb.mxu1 %v3806_v23  ;;  %v4325_v22 = vld [vmem:[#allocation13 + $0x10c] sm:$0xf]  ;;  %v3727_v23 = vld [vmem:[#allocation13 + $0x118] sm:$0xf0]  ;;  %v3726_v37 = vor.u32 %v4327_v10, %v3725_v31  ;;  %v3602_v38 = vor.u32 %v4293_v32, %v3599_v34  ;;  %v3901_v8 = vld [vmem:[#allocation14 + $0x70] sm:$0xf] }
 0x2af   :  { %2186 = vmatpush.bf16.msra.mxu2 %v3594_v7  ;;  %2199 = vmatpush.bf16.msra.mxu3 %v3722_v12  ;;  %v3758_v7 = vor.u32 %v4335_v5, %v3757_v0  ;;  %v4301_v12 = vld [vmem:[#allocation13 + $0x4c] sm:$0xf]  ;;  %v4371_v19 = vld [vmem:[#allocation14 + $0x74] sm:$0xf0]  ;;  %v3965_v42 = vld [vmem:[#allocation14 + $0xf0] sm:$0xf] }
 0x2b0   :  { %v3902_v52 = vor.u32 %v4371_v19, %v3901_v8  ;;  %v4367_v0 = vld [vmem:[#allocation14 + $0x54] sm:$0xf0]  ;;  %v3941_v27 = vld [vmem:[#allocation14 + $0xc0] sm:$0xf]  ;;  %v3997_v34 = vld [vmem:[#allocation14 + $0x130] sm:$0xf] }
 0x2b1   :  { %2208 = vmatpush.bf16.msrb.mxu0 %v3662_v41  ;;  %v4363_v31 = vld [vmem:[#allocation14 + $0x34] sm:$0xf0] }
 0x2b2   :  { %v4928_v33 = vpop.eup %4437  ;;  %2221 = vmatpush.bf16.msrb.mxu1 %v3790_v43  ;;  %v4387_v43 = vld [vmem:[#allocation14 + $0xf4] sm:$0xf0] }
 0x2b3   :  { %v4930_v21 = vpop.eup %4439  ;;  %2231 = vmatpush.bf16.msrb.mxu2 %v3714_v61  ;;  %2244 = vmatpush.bf16.msrb.mxu3 %v3842_v16  ;;  %v3759_v61 = vld [vmem:[#allocation13 + $0x158] sm:$0xf0]  ;;  %v3613_v16 = vld [vmem:[#allocation13 + $0x28] sm:$0xf]  ;;  %v4379_v10 = vld [vmem:[#allocation14 + $0xb4] sm:$0xf0] }
 0x2b4   :  { %v1749_v13 = vadd.f32 %v4930_v21, %v4928_v33  ;;  %v3762_v18 = vor.u32 %v4333_v14, %v3759_v61  ;;  %v3614_v20 = vor.u32 %v4299_v17, %v3613_v16  ;;  %v4077_v61 = vld [vmem:[#allocation14 + $0x1d0] sm:$0xf]  ;;  %v4415_v16 = vld [vmem:[#allocation14 + $0x1d4] sm:$0xf0]  ;;  %v3886_v17 = vor.u32 %v4367_v0, %v3885_v29  ;;  %v4393_v29 = vld [vmem:[#allocation14 + $0x124] sm:$0xf0] }
 0x2b5   :  { %2209 = vmatpush.bf16.msrb.mxu0 %v3646_v51  ;;  %v4359_v19 = vld [vmem:[#allocation14 + $0x14] sm:$0xf0] }
 0x2b6   :  { %1750 = vadd.xlane.f32.xlu1 %v1749_v13  ;;  %2222 = vmatpush.bf16.msrb.mxu1 %v3774_v55  ;;  %v3631_v13 = vld [vmem:[#allocation13 + $0x58] sm:$0xf0]  ;;  %v4385_v55 = vld [vmem:[#allocation14 + $0xe4] sm:$0xf0] }
 0x2b7   :  { %2232 = vmatpush.bf16.msrb.mxu2 %v3698_v26  ;;  %2245 = vmatpush.bf16.msrb.mxu3 %v3826_v62  ;;  %v3634_v15 = vor.u32 %v4301_v12, %v3631_v13  ;;  %v3743_v26 = vld [vmem:[#allocation13 + $0x138] sm:$0xf0]  ;;  %v3597_v62 = vld [vmem:[#allocation13 + $0x8] sm:$0xf]  ;;  %v3958_v5 = vor.u32 %v4385_v55, %v3957_v54  ;;  %v4013_v13 = vld [vmem:[#allocation14 + $0x150] sm:$0xf] }
 0x2b8   :  { %v3746_v1 = vor.u32 %v4329_v4, %v3743_v26  ;;  %v4078_v4 = vor.u32 %v4415_v16, %v4077_v61  ;;  %v4005_v26 = vld [vmem:[#allocation14 + $0x140] sm:$0xf]  ;;  %v4373_v54 = vld [vmem:[#allocation14 + $0x84] sm:$0xf0]  ;;  %v3959_v61 = vld [vmem:[#allocation14 + $0xe8] sm:$0xf0] }
 0x2b9   :  { %2210 = vmatpush.bf16.msrb.mxu0 %v3630_v6  ;;  %v3949_v6 = vld [vmem:[#allocation14 + $0xd0] sm:$0xf]  ;;  %v4069_v55 = vld [vmem:[#allocation14 + $0x1c0] sm:$0xf] }
 0x2ba   :  { %2223 = vmatpush.bf16.msrb.mxu1 %v3758_v7  ;;  %v4383_v7 = vld [vmem:[#allocation14 + $0xd4] sm:$0xf0] }
 0x2bb   :  { %2233 = vmatpush.bf16.msrb.mxu2 %v3682_v36  ;;  %2246 = vmatpush.bf16.msrb.mxu3 %v3810_v39  ;;  %v3598_v36 = vor.u32 %v4295_v63, %v3597_v62  ;;  %v3730_v39 = vor.u32 %v4325_v22, %v3727_v23  ;;  %v3950_v2 = vor.u32 %v4383_v7, %v3949_v6  ;;  %v3869_v62 = vld [vmem:[#allocation14 + $0x30] sm:$0xf]  ;;  %v4395_v22 = vld [vmem:[#allocation14 + $0x134] sm:$0xf0]  ;;  %v3887_v6 = vld [vmem:[#allocation14 + $0x58] sm:$0xf0] }
 0x2bc   :  { %v3870_v23 = vor.u32 %v4363_v31, %v3869_v62  ;;  %v4389_v31 = vld [vmem:[#allocation14 + $0x104] sm:$0xf0] }
 0x2bd   :  { %2211 = vmatpush.bf16.msrb.mxu0 %v3614_v20  ;;  %v4381_v20 = vld [vmem:[#allocation14 + $0xc4] sm:$0xf0] }
 0x2be   :  { %2224 = vmatpush.bf16.msrb.mxu1 %v3742_v30  ;;  %v4397_v30 = vld [vmem:[#allocation14 + $0x144] sm:$0xf0]  ;;  %v3942_v63 = vor.u32 %v4381_v20, %v3941_v27  ;;  %v3879_v27 = vld [vmem:[#allocation14 + $0x48] sm:$0xf0] }
 0x2bf   :  { %2234 = vmatpush.bf16.msrb.mxu2 %v3666_v44  ;;  %2247 = vmatpush.bf16.msrb.mxu3 %v3794_v48  ;;  %v4029_v44 = vld [vmem:[#allocation14 + $0x170] sm:$0xf]  ;;  %v4403_v48 = vld [vmem:[#allocation14 + $0x174] sm:$0xf0]  ;;  %v4006_v32 = vor.u32 %v4397_v30, %v4005_v26  ;;  %v4382_v30 = vld [vmem:[#allocation14 + $0xd4] sm:$0xf] }
 0x2c1   :  { %2212 = vmatpush.bf16.msrb.mxu0 %v3598_v36  ;;  %v3861_v36 = vld [vmem:[#allocation14 + $0x20] sm:$0xf] }
 0x2c2   :  { %2225 = vmatpush.bf16.msrb.mxu1 %v3726_v37 }
 0x2c3   :  { %2235 = vmatpush.bf16.msrb.mxu2 %v3650_v56  ;;  %2248 = vmatpush.bf16.msrb.mxu3 %v3778_v59  ;;  %v4030_v56 = vor.u32 %v4403_v48, %v4029_v44  ;;  %v4357_v48 = vld [vmem:[#allocation14 + $0x4] sm:$0xf0] }
 0x2c7   :  { %2236 = vmatpush.bf16.msrb.mxu2 %v3634_v15  ;;  %2249 = vmatpush.bf16.msrb.mxu3 %v3762_v18  ;;  %v4399_v15 = vld [vmem:[#allocation14 + $0x154] sm:$0xf0]  ;;  %v3877_v18 = vld [vmem:[#allocation14 + $0x40] sm:$0xf] }
 0x2c8   :  { %v4014_v28 = vor.u32 %v4399_v15, %v4013_v13  ;;  %v4411_v13 = vld [vmem:[#allocation14 + $0x1b4] sm:$0xf0]  ;;  %v4384_v15 = vld [vmem:[#allocation14 + $0xe4] sm:$0xf] }
 0x2c9   :  { %v3962_v16 = vor.u32 %v4384_v15, %v3959_v61  ;;  %v3919_v15 = vld [vmem:[#allocation14 + $0x98] sm:$0xf0]  ;;  %v4414_v61 = vld [vmem:[#allocation14 + $0x1d4] sm:$0xf] }
 0x2cb   :  { %2237 = vmatpush.bf16.msrb.mxu2 %v3618_v3  ;;  %2250 = vmatpush.bf16.msrb.mxu3 %v3746_v1  ;;  %v3878_v3 = vor.u32 %v4365_v9, %v3877_v18  ;;  %v3933_v1 = vld [vmem:[#allocation14 + $0xb0] sm:$0xf]  ;;  %v4391_v18 = vld [vmem:[#allocation14 + $0x114] sm:$0xf0]  ;;  %v4364_v9 = vld [vmem:[#allocation14 + $0x44] sm:$0xf] }
 0x2cc   :  { %v3934_v37 = vor.u32 %v4379_v10, %v3933_v1  ;;  %v3882_v20 = vor.u32 %v4364_v9, %v3879_v27  ;;  %v4362_v10 = vld [vmem:[#allocation14 + $0x34] sm:$0xf]  ;;  %v3999_v9 = vld [vmem:[#allocation14 + $0x138] sm:$0xf0]  ;;  %v4953_v27 = vld [vmem:[%s4977_s9] sm:$0xf] }
 0x2cf   :  { %2238 = vmatpush.bf16.msrb.mxu2 %v3602_v38  ;;  %2251 = vmatpush.bf16.msrb.mxu3 %v3730_v39  ;;  %v4361_v38 = vld [vmem:[#allocation14 + $0x24] sm:$0xf0]  ;;  %v3925_v39 = vld [vmem:[#allocation14 + $0xa0] sm:$0xf] }
 0x329   :  { %v1751_v24 = vpop.xlane.xlu1 %1750 }
 0x32a   :  { %4441 = vrcp.f32 %v1751_v24  ;;  %v4377_v24 = vld [vmem:[#allocation14 + $0xa4] sm:$0xf0] }
 0x32b   :  { %v3926_v8 = vor.u32 %v4377_v24, %v3925_v39  ;;  %v4380_v24 = vld [vmem:[#allocation14 + $0xc4] sm:$0xf] }
 0x330   :  { %v4442_v25 = vpop.eup %4441 }
 0x331   :  { %v1753_v40 = vmul.f32 %v4442_v25, %v4928_v33  ;;  %v1754_v41 = vmul.f32 %v4442_v25, %v4930_v21  ;;  %v3893_v33 = vld [vmem:[#allocation14 + $0x60] sm:$0xf]  ;;  %v3966_v21 = vor.u32 %v4387_v43, %v3965_v42  ;;  %v3998_v25 = vor.u32 %v4395_v22, %v3997_v34  ;;  %v3917_v42 = vld [vmem:[#allocation14 + $0x90] sm:$0xf]  ;;  %v4375_v43 = vld [vmem:[#allocation14 + $0x94] sm:$0xf0] }
 0x332   :  { %v3894_v59 = vor.u32 %v4369_v53, %v3893_v33  ;;  %v3895_v33 = vld [vmem:[#allocation14 + $0x68] sm:$0xf0]  ;;  %v4402_v34 = vld [vmem:[#allocation14 + $0x174] sm:$0xf] }
 0x333   :  { %v1755_v45 = vmul.f32 %v1753_v40, %v4905_v35  ;;  %v1756_v47 = vmul.f32 %v1754_v41, %v4913_v46  ;;  %v4401_v35 = vld [vmem:[#allocation14 + $0x164] sm:$0xf0]  ;;  %v4085_v46 = vld [vmem:[#allocation14 + $0x1e0] sm:$0xf]  ;;  %v3862_v40 = vor.u32 %v4361_v38, %v3861_v36  ;;  %v3853_v41 = vld [vmem:[#allocation14 + $0x10] sm:$0xf] }
 0x334   :  { %v4022_v12 = vor.u32 %v4401_v35, %v4021_v57  ;;  %v4086_v14 = vor.u32 %v4417_v58, %v4085_v46  ;;  %v3854_v44 = vor.u32 %v4359_v19, %v3853_v41  ;;  %v4413_v57 = vld [vmem:[#allocation14 + $0x1c4] sm:$0xf0]  ;;  %v3967_v35 = vld [vmem:[#allocation14 + $0xf8] sm:$0xf0]  ;;  %v4045_v36 = vld [vmem:[#allocation14 + $0x190] sm:$0xf] }
 0x335   :  { %v4938_v50 = vpack.c.bf16 %v1755_v45, %v1755_v45  ;;  %v4940_v51 = vpack.c.bf16 %v1756_v47, %v1756_v47  ;;  %v3918_v45 = vor.u32 %v4375_v43, %v3917_v42  ;;  %v3845_v47 = vld [vmem:[#allocation14] sm:$0xf]  ;;  %v4070_v46 = vor.u32 %v4413_v57, %v4069_v55  ;;  %v4360_v41 = vld [vmem:[#allocation14 + $0x24] sm:$0xf]  ;;  %v4023_v43 = vld [vmem:[#allocation14 + $0x168] sm:$0xf0] }
 0x336   :  { %v4400_v19 = vld [vmem:[#allocation14 + $0x164] sm:$0xf] }
 0x337   :  { %2161 = vmatmul.bf16.vlgmr.msra.gmra.mxu0 %v4938_v50  ;;  %2174 = vmatmul.bf16.vlgmr.msra.gmra.mxu1 %v4940_v51 }
 0x338   :  { %2187 = vmatmul.bf16.vlgmr.msra.gmra.mxu2 %v4938_v50  ;;  %2200 = vmatmul.bf16.vlgmr.msra.gmra.mxu3 %v4940_v51 }
 0x339   :  { %2663 = vmatpush.bf16.msra.mxu0 %v3902_v52  ;;  %2676 = vmatpush.bf16.msra.mxu1 %v3966_v21  ;;  %v4368_v52 = vld [vmem:[#allocation14 + $0x64] sm:$0xf]  ;;  %v3909_v21 = vld [vmem:[#allocation14 + $0x80] sm:$0xf] }
 0x33a   :  { %2689 = vmatpush.bf16.msra.mxu2 %v4030_v56  ;;  %2702 = vmatpush.bf16.msra.mxu3 %v4094_v11  ;;  %v3898_v53 = vor.u32 %v4368_v52, %v3895_v33  ;;  %v3910_v56 = vor.u32 %v4373_v54, %v3909_v21  ;;  %v4386_v11 = vld [vmem:[#allocation14 + $0xf4] sm:$0xf]  ;;  %v4095_v52 = vld [vmem:[#allocation14 + $0x1f8] sm:$0xf0] }
 0x33b   :  { %v3970_v58 = vor.u32 %v4386_v11, %v3967_v35  ;;  %v3855_v21 = vld [vmem:[#allocation14 + $0x18] sm:$0xf0]  ;;  %v4398_v54 = vld [vmem:[#allocation14 + $0x154] sm:$0xf]  ;;  %v4376_v11 = vld [vmem:[#allocation14 + $0xa4] sm:$0xf] }
 0x33c   :  { %v3927_v35 = vld [vmem:[#allocation14 + $0xa8] sm:$0xf0] }
 0x33d   :  { %2664 = vmatpush.bf16.msra.mxu0 %v3894_v59  ;;  %2677 = vmatpush.bf16.msra.mxu1 %v3958_v5  ;;  %v3989_v59 = vld [vmem:[#allocation14 + $0x120] sm:$0xf]  ;;  %v4366_v5 = vld [vmem:[#allocation14 + $0x54] sm:$0xf] }
 0x33e   :  { %2690 = vmatpush.bf16.msra.mxu2 %v4022_v12  ;;  %2703 = vmatpush.bf16.msra.mxu3 %v4086_v14  ;;  %v3990_v0 = vor.u32 %v4393_v29, %v3989_v59  ;;  %v3890_v7 = vor.u32 %v4366_v5, %v3887_v6  ;;  %v4061_v12 = vld [vmem:[#allocation14 + $0x1b0] sm:$0xf]  ;;  %v4087_v59 = vld [vmem:[#allocation14 + $0x1e8] sm:$0xf0]  ;;  %v4396_v6 = vld [vmem:[#allocation14 + $0x144] sm:$0xf] }
 0x33f   :  { %v4062_v14 = vor.u32 %v4411_v13, %v4061_v12  ;;  %v3847_v5 = vld [vmem:[#allocation14 + $0x8] sm:$0xf0] }
 0x340   :  { %v4007_v12 = vld [vmem:[#allocation14 + $0x148] sm:$0xf0] }
 0x341   :  { %2665 = vmatpush.bf16.msra.mxu0 %v3886_v17  ;;  %2678 = vmatpush.bf16.msra.mxu1 %v3950_v2  ;;  %v3981_v17 = vld [vmem:[#allocation14 + $0x110] sm:$0xf]  ;;  %v4010_v13 = vor.u32 %v4396_v6, %v4007_v12  ;;  %v1828_v12 = vperm.slane %v4953_v27, 3 }
 0x342   :  { %2691 = vmatpush.bf16.msra.mxu2 %v4014_v28  ;;  %2704 = vmatpush.bf16.msra.mxu3 %v4078_v4  ;;  %v3982_v2 = vor.u32 %v4391_v18, %v3981_v17  ;;  %v4053_v28 = vld [vmem:[#allocation14 + $0x1a0] sm:$0xf]  ;;  %v4409_v4 = vld [vmem:[#allocation14 + $0x1a4] sm:$0xf0]  ;;  %v4079_v17 = vld [vmem:[#allocation14 + $0x1d8] sm:$0xf0] }
 0x343   :  { %v4054_v26 = vor.u32 %v4409_v4, %v4053_v28  ;;  %v4082_v18 = vor.u32 %v4414_v61, %v4079_v17  ;;  %v4372_v28 = vld [vmem:[#allocation14 + $0x84] sm:$0xf]  ;;  %v3911_v4 = vld [vmem:[#allocation14 + $0x88] sm:$0xf0] }
 0x345   :  { %2666 = vmatpush.bf16.msra.mxu0 %v3878_v3  ;;  %2679 = vmatpush.bf16.msra.mxu1 %v3942_v63  ;;  %v3951_v3 = vld [vmem:[#allocation14 + $0xd8] sm:$0xf0]  ;;  %v3973_v63 = vld [vmem:[#allocation14 + $0x100] sm:$0xf] }
 0x346   :  { %2692 = vmatpush.bf16.msra.mxu2 %v4006_v32  ;;  %2705 = vmatpush.bf16.msra.mxu3 %v4070_v46  ;;  %v3954_v62 = vor.u32 %v4382_v30, %v3951_v3  ;;  %v3974_v1 = vor.u32 %v4389_v31, %v3973_v63  ;;  %v3871_v32 = vld [vmem:[#allocation14 + $0x38] sm:$0xf0]  ;;  %v4416_v46 = vld [vmem:[#allocation14 + $0x1e4] sm:$0xf]  ;;  %v3914_v30 = vor.u32 %v4372_v28, %v3911_v4  ;;  %v4071_v3 = vld [vmem:[#allocation14 + $0x1c8] sm:$0xf0] }
 0x347   :  { %2213 = vmatmul.bf16.vlgmr.msrb.gmra.mxu0 %v4938_v50  ;;  %2226 = vmatmul.bf16.vlgmr.msrb.gmra.mxu1 %v4940_v51  ;;  %v3874_v22 = vor.u32 %v4362_v10, %v3871_v32  ;;  %v4090_v29 = vor.u32 %v4416_v46, %v4087_v59  ;;  %v4392_v31 = vld [vmem:[#allocation14 + $0x124] sm:$0xf]  ;;  %v4410_v32 = vld [vmem:[#allocation14 + $0x1b4] sm:$0xf] }
 0x348   :  { %2239 = vmatmul.bf16.vlgmr.msrb.gmra.mxu2 %v4938_v50  ;;  %2252 = vmatmul.bf16.vlgmr.msrb.gmra.mxu3 %v4940_v51  ;;  %v3846_v50 = vor.u32 %v4357_v48, %v3845_v47  ;;  %v3906_v51 = vor.u32 %v4370_v49, %v3903_v60  ;;  %v4026_v47 = vor.u32 %v4400_v19, %v4023_v43  ;;  %v4378_v49 = vld [vmem:[#allocation14 + $0xb4] sm:$0xf]  ;;  %v3935_v60 = vld [vmem:[#allocation14 + $0xb8] sm:$0xf0]  ;;  %v1826_v43 = vperm.slane %v4953_v27, 1 }
 0x349   :  { %2667 = vmatpush.bf16.msra.mxu0 %v3870_v23  ;;  %2680 = vmatpush.bf16.msra.mxu1 %v3934_v37  ;;  %v4031_v23 = vld [vmem:[#allocation14 + $0x178] sm:$0xf0]  ;;  %v4407_v37 = vld [vmem:[#allocation14 + $0x194] sm:$0xf0] }
 0x34a   :  { %2693 = vmatpush.bf16.msra.mxu2 %v3998_v25  ;;  %2706 = vmatpush.bf16.msra.mxu3 %v4062_v14  ;;  %v4034_v38 = vor.u32 %v4402_v34, %v4031_v23  ;;  %v4046_v39 = vor.u32 %v4407_v37, %v4045_v36  ;;  %v3943_v25 = vld [vmem:[#allocation14 + $0xc8] sm:$0xf0]  ;;  %v4374_v14 = vld [vmem:[#allocation14 + $0x94] sm:$0xf]  ;;  %v4063_v34 = vld [vmem:[#allocation14 + $0x1b8] sm:$0xf0] }
 0x34b   :  { %v4066_v36 = vor.u32 %v4410_v32, %v4063_v34  ;;  %v2337_v34 = vld [vmem:[%s4979_s11] sm:$0x3] }
 0x34d   :  { %2668 = vmatpush.bf16.msra.mxu0 %v3862_v40  ;;  %2681 = vmatpush.bf16.msra.mxu1 %v3926_v8  ;;  %v3946_v40 = vor.u32 %v4380_v24, %v3943_v25  ;;  %v3863_v8 = vld [vmem:[#allocation14 + $0x28] sm:$0xf0]  ;;  %v4408_v24 = vld [vmem:[#allocation14 + $0x1a4] sm:$0xf] }
 0x34e   :  { %2694 = vmatpush.bf16.msra.mxu2 %v3990_v0  ;;  %2707 = vmatpush.bf16.msra.mxu3 %v4054_v26  ;;  %v3866_v42 = vor.u32 %v4360_v41, %v3863_v8  ;;  %v4356_v0 = vld [vmem:[#allocation14 + $0x4] sm:$0xf]  ;;  %v3975_v8 = vld [vmem:[#allocation14 + $0x108] sm:$0xf0] }
 0x34f   :  { %v4412_v26 = vld [vmem:[#allocation14 + $0x1c4] sm:$0xf] }
 0x350   :  { %v4074_v63 = vor.u32 %v4412_v26, %v4071_v3  ;;  %v4388_v41 = vld [vmem:[#allocation14 + $0x104] sm:$0xf] }
 0x351   :  { %2669 = vmatpush.bf16.msra.mxu0 %v3854_v44  ;;  %2682 = vmatpush.bf16.msra.mxu1 %v3918_v45  ;;  %v4037_v44 = vld [vmem:[#allocation14 + $0x180] sm:$0xf]  ;;  %v4405_v45 = vld [vmem:[#allocation14 + $0x184] sm:$0xf0] }
 0x352   :  { %2695 = vmatpush.bf16.msra.mxu2 %v3982_v2  ;;  %2708 = vmatpush.bf16.msra.mxu3 %v4046_v39  ;;  %v4038_v48 = vor.u32 %v4405_v45, %v4037_v44  ;;  %v4394_v2 = vld [vmem:[#allocation14 + $0x134] sm:$0xf]  ;;  %v3983_v39 = vld [vmem:[#allocation14 + $0x118] sm:$0xf0] }
 0x353   :  { %v4406_v44 = vld [vmem:[#allocation14 + $0x194] sm:$0xf]  ;;  %v4047_v45 = vld [vmem:[#allocation14 + $0x198] sm:$0xf0] }
 0x355   :  { %2670 = vmatpush.bf16.msra.mxu0 %v3846_v50  ;;  %2683 = vmatpush.bf16.msra.mxu1 %v3910_v56  ;;  %v3938_v50 = vor.u32 %v4378_v49, %v3935_v60  ;;  %v4015_v56 = vld [vmem:[#allocation14 + $0x158] sm:$0xf0] }
 0x356   :  { %2696 = vmatpush.bf16.msra.mxu2 %v3974_v1  ;;  %2709 = vmatpush.bf16.msra.mxu3 %v4038_v48  ;;  %v4018_v57 = vor.u32 %v4398_v54, %v4015_v56  ;;  %v3991_v1 = vld [vmem:[#allocation14 + $0x128] sm:$0xf0]  ;;  %v3978_v48 = vor.u32 %v4388_v41, %v3975_v8 }
 0x357   :  { %v3994_v10 = vor.u32 %v4392_v31, %v3991_v1  ;;  %v4039_v56 = vld [vmem:[#allocation14 + $0x188] sm:$0xf0] }
 0x359   :  { %2715 = vmatpush.bf16.msrb.mxu0 %v3906_v51  ;;  %2728 = vmatpush.bf16.msrb.mxu1 %v3970_v58  ;;  %v4418_v51 = vld [vmem:[#allocation14 + $0x1f4] sm:$0xf]  ;;  %v3930_v58 = vor.u32 %v4376_v11, %v3927_v35  ;;  %v1827_v35 = vperm.slane %v4953_v27, 2 }
 0x35a   :  { %2741 = vmatpush.bf16.msrb.mxu2 %v4034_v38  ;;  %v4098_v33 = vor.u32 %v4418_v51, %v4095_v52  ;;  %v4390_v38 = vld [vmem:[#allocation14 + $0x114] sm:$0xf]  ;;  %v4050_v51 = vor.u32 %v4406_v44, %v4047_v45  ;;  %v2773_v45 = vld [vmem:[%s4980_s12] sm:$0x3] }
 0x35b   :  { %v3986_v25 = vor.u32 %v4390_v38, %v3983_v39 }
 0x35c   :  { %2754 = vmatpush.bf16.msrb.mxu3 %v4098_v33 }
 0x35d   :  { %2716 = vmatpush.bf16.msrb.mxu0 %v3898_v53  ;;  %2729 = vmatpush.bf16.msrb.mxu1 %v3962_v16  ;;  %v4358_v53 = vld [vmem:[#allocation14 + $0x14] sm:$0xf]  ;;  %v3922_v16 = vor.u32 %v4374_v14, %v3919_v15 }
 0x35e   :  { %2742 = vmatpush.bf16.msrb.mxu2 %v4026_v47  ;;  %v3858_v55 = vor.u32 %v4358_v53, %v3855_v21 }
 0x360   :  { %2755 = vmatpush.bf16.msrb.mxu3 %v4090_v29 }
 0x361   :  { %2717 = vmatpush.bf16.msrb.mxu0 %v3890_v7  ;;  %2730 = vmatpush.bf16.msrb.mxu1 %v3954_v62  ;;  %v3850_v7 = vor.u32 %v4356_v0, %v3847_v5  ;;  %v1825_v62 = vperm.slane %v4953_v27, 0 }
 0x362   :  { %2743 = vmatpush.bf16.msrb.mxu2 %v4018_v57 }
 0x364   :  { %2756 = vmatpush.bf16.msrb.mxu3 %v4082_v18 }
 0x365   :  { %2718 = vmatpush.bf16.msrb.mxu0 %v3882_v20  ;;  %2731 = vmatpush.bf16.msrb.mxu1 %v3946_v40  ;;  %v4002_v20 = vor.u32 %v4394_v2, %v3999_v9  ;;  %v4055_v40 = vld [vmem:[#allocation14 + $0x1a8] sm:$0xf0] }
 0x366   :  { %2744 = vmatpush.bf16.msrb.mxu2 %v4010_v13 }
 0x368   :  { %2757 = vmatpush.bf16.msrb.mxu3 %v4074_v63 }
 0x369   :  { %2719 = vmatpush.bf16.msrb.mxu0 %v3874_v22  ;;  %2732 = vmatpush.bf16.msrb.mxu1 %v3938_v50 }
 0x36a   :  { %2745 = vmatpush.bf16.msrb.mxu2 %v4002_v20 }
 0x36c   :  { %2758 = vmatpush.bf16.msrb.mxu3 %v4066_v36 }
 0x36d   :  { %2720 = vmatpush.bf16.msrb.mxu0 %v3866_v42  ;;  %2733 = vmatpush.bf16.msrb.mxu1 %v3930_v58  ;;  %v4058_v42 = vor.u32 %v4408_v24, %v4055_v40  ;;  %v2340_v24 = vperm.slane %v2337_v34, 1 }
 0x36e   :  { %2746 = vmatpush.bf16.msrb.mxu2 %v3994_v10 }
 0x370   :  { %2759 = vmatpush.bf16.msrb.mxu3 %v4058_v42 }
 0x371   :  { %2721 = vmatpush.bf16.msrb.mxu0 %v3858_v55  ;;  %2734 = vmatpush.bf16.msrb.mxu1 %v3922_v16  ;;  %v4404_v55 = vld [vmem:[#allocation14 + $0x184] sm:$0xf] }
 0x372   :  { %2747 = vmatpush.bf16.msrb.mxu2 %v3986_v25  ;;  %v4042_v57 = vor.u32 %v4404_v55, %v4039_v56  ;;  %v4432_v56 = vld [vmem:[#allocation2] ss:$0 sm:$0xff] }
 0x374   :  { %2760 = vmatpush.bf16.msrb.mxu3 %v4050_v51 }
 0x375   :  { %2722 = vmatpush.bf16.msrb.mxu0 %v3850_v7  ;;  %2735 = vmatpush.bf16.msrb.mxu1 %v3914_v30 }
 0x376   :  { %2748 = vmatpush.bf16.msrb.mxu2 %v3978_v48 }
 0x378   :  { %2761 = vmatpush.bf16.msrb.mxu3 %v4042_v57 }
 0x3b4   :  { %v2162_v22 = vpop.f32.mrf.mxu0  ;;  %v2175_v23 = vpop.f32.mrf.mxu1 }
 0x3b5   :  { %v2163_v37 = vadd.f32 %v2162_v22, %v1825_v62 }
 0x3b7   :  { %v2176_v19 = vadd.f32 %v2175_v23, %v2163_v37  ;;  %v2339_v23 = vperm.slane %v2337_v34, 0 }
 0x3b9   :  { %vm2257_vm10 = vcmp.ge.f32.partialorder %v2176_v19, 0.0  ;;  %v2261_v47 = vmul.f32 0.01, %v2176_v19 }
 0x3bb   :  { %v2265_v49 = vsel %vm2257_vm10, %v2176_v19, %v2261_v47  ;;  %v2188_v60 = vpop.f32.mrf.mxu2  ;;  %v2201_v50 = vpop.f32.mrf.mxu3 }
 0x3bc   :  { %v2269_v52 = vpack.c.bf16 %v2265_v49, %v2265_v49  ;;  %v2189_v33 = vadd.f32 %v2188_v60, %v1826_v43  ;;  %v2164_v53 = vpop.f32.mrf.mxu0  ;;  %v2177_v21 = vpop.f32.mrf.mxu1  ;;  %v2775_v60 = vperm.slane %v2773_v45, 0 }
 0x3be   :  { %v2202_v54 = vadd.f32 %v2201_v50, %v2189_v33  ;;  %2671 = vmatmul.bf16.vlgmr.msra.gmra.mxu0 %v2269_v52  ;;  %v2776_v50 = vperm.slane %v2773_v45, 1 }
 0x3c0   :  { %vm2258_vm11 = vcmp.ge.f32.partialorder %v2202_v54, 0.0  ;;  %v2262_v11 = vmul.f32 0.01, %v2202_v54 }
 0x3c2   :  { %v2266_v46 = vsel %vm2258_vm11, %v2202_v54, %v2262_v11 }
 0x3c3   :  { %v2270_v58 = vpack.c.bf16 %v2266_v46, %v2266_v46  ;;  %v2190_v59 = vpop.f32.mrf.mxu2  ;;  %v2203_v29 = vpop.f32.mrf.mxu3 }
 0x3c4   :  { %v2214_v0 = vpop.f32.mrf.mxu0  ;;  %v2227_v5 = vpop.f32.mrf.mxu1 }
 0x3c5   :  { %v2215_v6 = vadd.f32 %v2214_v0, %v1827_v35  ;;  %2684 = vmatmul.bf16.vlgmr.msra.gmra.mxu1 %v2270_v58 }
 0x3c7   :  { %v2228_v7 = vadd.f32 %v2227_v5, %v2215_v6 }
 0x3c9   :  { %vm2259_vm12 = vcmp.ge.f32.partialorder %v2228_v7, 0.0  ;;  %v2263_v13 = vmul.f32 0.01, %v2228_v7 }
 0x3cb   :  { %v2267_v14 = vsel %vm2259_vm12, %v2228_v7, %v2263_v13  ;;  %v2240_v15 = vpop.f32.mrf.mxu2  ;;  %v2253_v61 = vpop.f32.mrf.mxu3 }
 0x3cc   :  { %v2271_v16 = vpack.c.bf16 %v2267_v14, %v2267_v14  ;;  %v2241_v17 = vadd.f32 %v2240_v15, %v1828_v12  ;;  %v2216_v18 = vpop.f32.mrf.mxu0  ;;  %v2229_v2 = vpop.f32.mrf.mxu1 }
 0x3ce   :  { %v2254_v9 = vadd.f32 %v2253_v61, %v2241_v17  ;;  %2697 = vmatmul.bf16.vlgmr.msra.gmra.mxu2 %v2271_v16  ;;  %2723 = vmatmul.bf16.vlgmr.msrb.gmra.mxu0 %v2269_v52 }
 0x3d0   :  { %vm2260_vm13 = vcmp.ge.f32.partialorder %v2254_v9, 0.0  ;;  %v2264_v20 = vmul.f32 0.01, %v2254_v9 }
 0x3d2   :  { %v2268_v28 = vsel %vm2260_vm13, %v2254_v9, %v2264_v20 }
 0x3d3   :  { %v2272_v4 = vpack.c.bf16 %v2268_v28, %v2268_v28  ;;  %v2242_v26 = vpop.f32.mrf.mxu2  ;;  %v2255_v30 = vpop.f32.mrf.mxu3 }
 0x3d5   :  { %2710 = vmatmul.bf16.vlgmr.msra.gmra.mxu3 %v2272_v4  ;;  %2736 = vmatmul.bf16.vlgmr.msrb.gmra.mxu1 %v2270_v58 }
 0x3de   :  { %2749 = vmatmul.bf16.vlgmr.msrb.gmra.mxu2 %v2271_v16 }
 0x3e5   :  { %2762 = vmatmul.bf16.vlgmr.msrb.gmra.mxu3 %v2272_v4 }
 0x43b   :  { %v2672_v27 = vpop.f32.mrf.mxu0 }
 0x43c   :  { %v2673_v38 = vadd.f32 %v2672_v27, %v2339_v23 }
 0x442   :  { %v2685_v3 = vpop.f32.mrf.mxu1 }
 0x443   :  { %v2674_v62 = vpop.f32.mrf.mxu0  ;;  %v2686_v39 = vadd.f32 %v2685_v3, %v2673_v38 }
 0x44a   :  { %v2687_v63 = vpop.f32.mrf.mxu1 }
 0x44b   :  { %v2724_v31 = vpop.f32.mrf.mxu0 }
 0x44c   :  { %v2725_v8 = vadd.f32 %v2724_v31, %v2340_v24 }
 0x451   :  { %v2698_v1 = vpop.f32.mrf.mxu2 }
 0x452   :  { %v2737_v10 = vpop.f32.mrf.mxu1  ;;  %v2699_v40 = vadd.f32 %v2698_v1, %v2686_v39 }
 0x453   :  { %v2726_v32 = vpop.f32.mrf.mxu0  ;;  %v2738_v42 = vadd.f32 %v2737_v10, %v2725_v8 }
 0x458   :  { %v2711_v22 = vpop.f32.mrf.mxu3 }
 0x459   :  { %v2700_v36 = vpop.f32.mrf.mxu2  ;;  %v2712_v19 = vadd.f32 %v2711_v22, %v2699_v40 }
 0x45a   :  { %v2739_v37 = vpop.f32.mrf.mxu1 }
 0x45b   :  { %v2769_v43 = vmul.f32 0.01, %v2712_v19  ;;  %vm2767_vm14 = vcmp.ge.f32.partialorder %v2712_v19, 0.0 }
 0x45d   :  { %v2771_v52 = vsel %vm2767_vm14, %v2712_v19, %v2769_v43 }
 0x45e   :  { %v2779_v53 = vmul.f32 %v2775_v60, %v2771_v52 }
 0x460   :  { %v2713_v25 = vpop.f32.mrf.mxu3 }
 0x461   :  { %v2750_v41 = vpop.f32.mrf.mxu2 }
 0x462   :  { %v2751_v44 = vadd.f32 %v2750_v41, %v2738_v42 }
 0x468   :  { %v2763_v47 = vpop.f32.mrf.mxu3 }
 0x469   :  { %v2764_v48 = vadd.f32 %v2763_v47, %v2751_v44  ;;  %v2752_v49 = vpop.f32.mrf.mxu2 }
 0x46b   :  { %vm2768_vm15 = vcmp.ge.f32.partialorder %v2764_v48, 0.0  ;;  %v2770_v51 = vmul.f32 0.01, %v2764_v48 }
 0x46d   :  { %v2772_v33 = vsel %vm2768_vm15, %v2764_v48, %v2770_v51 }
 0x46e   :  { %v2780_v21 = vmul.f32 %v2776_v50, %v2772_v33 }
 0x470   :  { %v2765_v54 = vpop.f32.mrf.mxu3  ;;  %v2781_v55 = vadd.f32 %v2780_v21, %v2779_v53 }
 0x472   :  { %2782 = vadd.xlane.f32.xlu2 %v2781_v55 }
 0x4e5   :  { %v2783_v57 = vpop.xlane.xlu2 %2782 }
 0x4e6   :  { %v2788_v11 = vadd.f32 %v4432_v56, %v2783_v57 }
 0x4e8   :  { %v4099_v35 = vmul.f32 -1.442695, %v2788_v11 }
 0x4ea   :  { %4443 = vpow2.f32 %v4099_v35 }
 0x4f0   :  { %v4444_v46 = vpop.eup %4443 }
 0x4f1   :  { %v2792_v58 = vadd.f32 1.0, %v4444_v46 }
 0x4f3   :  { %4445 = vrcp.f32 %v2792_v58  ;;  %v2804_v5 = vand.u32 2147483648, %v2792_v58  ;;  %v2802_v7 = vand.u32 2147483647, %v2792_v58  ;;  %vm2798_vm1 = vweird.f32 %v2792_v58 }
 0x4f5   :  { %v2805_v13 = vor.u32 1.1754944e-38, %v2804_v5  ;;  %vm2803_vm4 = vcmp.eq.f32.partialorder %v2802_v7, 8.507059e+37 }
 0x4f9   :  { %v4446_v59 = vpop.eup %4445 }
 0x4fa   :  { %v2794_v29 = vmul.f32 %v4446_v59, %v2792_v58  ;;  %vm2799_vm0 = vweird.f32 %v4446_v59 }
 0x4fb   :  { %vm2800_vm3 = vmor %vm2798_vm1, %vm2799_vm0 }
 0x4fc   :  { %v2795_v0 = vsub.f32 1.0, %v2794_v29 }
 0x4fe   :  { %v2796_v6 = vmul.f32 %v4446_v59, %v2795_v0 }
 0x500   :  { %v2797_v12 = vadd.f32 %v4446_v59, %v2796_v6 }
 0x502   :  { %v2801_v14 = vsel %vm2800_vm3, %v4446_v59, %v2797_v12 }
 0x503   :  { %v2806_v15 = vsel %vm2803_vm4, %v2805_v13, %v2801_v14 }
 0x504   :  { %2809 = vst.msk [vmem:[%s4982_s14] sm:$0xff] %vm2808_vm2, %v2806_v15 }
 0x505   :  { %2814 = vsyncpa [#allocation4], 1 }
 0x506   :  { %2815 = vsyncpa [#allocation6], 1 }
 0x507   :  { %2816 = vsyncpa [#allocation9], 1 }
 0x508   :  { %2817 = vsyncpa [#allocation12], 1 }
 0x509   :  { %2818 = vsyncpa [#allocation15], 1 }

</bundles_post_ra>
